<compile_context>
chip_gen: v7x
topology: tpu7x:2x2x1
jax: 0.10.0
libtpu: 0.0.40
codegen_flags: <defaults>
</compile_context>

<pallas_src>
import functools

import jax
import jax.numpy as jnp
from jax.experimental import pallas as pl
from jax.experimental.pallas import tpu as pltpu


def _up2d_kernel(x_ref, w_ref, o_ref, xpad_ref, *, H, W, Cin, Cout, eps):
    # x_ref   : (1, H, W, Cin)        one image, NHWC, un-padded
    # w_ref   : (3, 3, Cin, 4*Cout)   shift-tap weights, parity fused on columns
    # o_ref   : (1, H, W, 4*Cout)     parity-packed, instance-normalized output
    # xpad_ref: (H+2, W+2, Cin)       VMEM scratch for the zero-padded ReLU(x)
    Cp = 4 * Cout

    # ReLU + zero-pad into VMEM scratch (padding never touches HBM).
    xpad_ref[...] = jnp.zeros((H + 2, W + 2, Cin), jnp.float32)
    xpad_ref[1:H + 1, 1:W + 1, :] = jnp.maximum(x_ref[0], 0.0)

    # Transposed conv (k=4, s=2, p=1): 9 static shifted taps of the padded
    # input, each contracted against a (Cin, 4*Cout) weight slab (all 4 output
    # parities on the MXU N axis), accumulated into one resident fp32 buffer.
    acc = jnp.zeros((H, W, Cp), jnp.float32)
    for dy in range(3):
        for dx in range(3):
            xs = xpad_ref[dy:dy + H, dx:dx + W, :]            # (H, W, Cin)
            acc = acc + jax.lax.dot_general(
                xs, w_ref[dy, dx], (((2,), (0,)), ((), ())),
                preferred_element_type=jnp.float32)

    # Instance norm over all spatial positions (H * W * 4 parities) per
    # channel.  Lane j of acc holds (parity p, channel c) with j = p*Cout + c;
    # P[i, j] = 1 iff (i mod Cout) == (j mod Cout) both reduces over the 4
    # parity groups and broadcasts the per-channel statistic back to all
    # 4*Cout lanes in a single tiny matmul.
    row = jax.lax.broadcasted_iota(jnp.int32, (Cp, Cp), 0)
    col = jax.lax.broadcasted_iota(jnp.int32, (Cp, Cp), 1)
    P = ((row % Cout) == (col % Cout)).astype(jnp.float32)    # (4*Cout, 4*Cout)

    inv_n = 1.0 / (4.0 * H * W)
    s1 = jnp.sum(acc, axis=(0, 1), keepdims=True)             # (1, 1, 4*Cout)
    mean_r = jax.lax.dot_general(
        s1, P, (((2,), (0,)), ((), ())),
        preferred_element_type=jnp.float32) * inv_n           # per-chan mean, bcast
    d = acc - mean_r
    s2 = jnp.sum(d * d, axis=(0, 1), keepdims=True)           # (1, 1, 4*Cout)
    var_r = jax.lax.dot_general(
        s2, P, (((2,), (0,)), ((), ())),
        preferred_element_type=jnp.float32) * inv_n           # per-chan var, bcast
    o_ref[...] = (d * jax.lax.rsqrt(var_r + eps))[None].astype(o_ref.dtype)


def _build_wbig(weight):
    """PyTorch ConvTranspose2d weight (Cin, Cout, 4, 4) -> (3, 3, Cin, 4*Cout).

    Shift (dy, dx) of the 1-padded input contributes kernel tap
    (ky, kx) = (3 + py - 2*dy, 3 + px - 2*dx) to output parity p = 2*py + px;
    out-of-range taps are zero."""
    Cin, Cout = weight.shape[0], weight.shape[1]
    w = jnp.zeros((3, 3, Cin, 4 * Cout), weight.dtype)
    for dy in range(3):
        for dx in range(3):
            for py in range(2):
                for px in range(2):
                    ky = 3 + py - 2 * dy
                    kx = 3 + px - 2 * dx
                    if 0 <= ky <= 3 and 0 <= kx <= 3:
                        p = 2 * py + px
                        w = w.at[dy, dx, :, p * Cout:(p + 1) * Cout].set(
                            weight[:, :, ky, kx])
    return w


def up_2d_forward(x_nchw, weight, bias, eps=1e-5):
    """x_nchw: (N, Cin, H, W); weight: (Cin, Cout, 4, 4); bias: (Cout,).
    Returns (N, Cout, 2H, 2W), matching the PyTorch up_2d module."""
    N, Cin, H, W = x_nchw.shape
    Cout = weight.shape[1]
    Cp = 4 * Cout

    # bias is intentionally unused: the no-affine InstanceNorm subtracts the
    # per-(n, c) mean, so a per-channel constant bias cancels exactly.
    del bias

    x = jnp.transpose(x_nchw, (0, 2, 3, 1)).astype(jnp.float32)      # NHWC
    wbig = _build_wbig(weight.astype(jnp.float32))                    # (3,3,Cin,4*Cout)

    conv = pl.pallas_call(
        functools.partial(_up2d_kernel, H=H, W=W, Cin=Cin, Cout=Cout, eps=eps),
        out_shape=jax.ShapeDtypeStruct((N, H, W, Cp), jnp.float32),
        grid=(N,),
        in_specs=[
            pl.BlockSpec((1, H, W, Cin), lambda n: (n, 0, 0, 0)),
            pl.BlockSpec((3, 3, Cin, Cp), lambda n: (0, 0, 0, 0)),
        ],
        out_specs=pl.BlockSpec((1, H, W, Cp), lambda n: (n, 0, 0, 0)),
        scratch_shapes=[pltpu.VMEM((H + 2, W + 2, Cin), jnp.float32)],
        compiler_params=pltpu.CompilerParams(
            dimension_semantics=("parallel",),
            vmem_limit_bytes=64 * 1024 * 1024),
    )(x, wbig)

    # Parity interleave + NCHW conversion fused into ONE XLA transpose pass
    # (both reshapes are contiguous / free).
    y = conv.reshape(N, H, W, 2, 2, Cout)            # (n, h, w, py, px, c)
    y = jnp.transpose(y, (0, 5, 1, 3, 2, 4))         # (n, c, h, py, w, px)
    return y.reshape(N, Cout, 2 * H, 2 * W)


def _reference(x_nchw, weight, bias, eps=1e-5):
    """Pure-JAX reference: ReLU -> ConvTranspose2d (with bias) -> InstanceNorm2d."""
    x = jnp.maximum(x_nchw.astype(jnp.float32), 0.0)
    x_nhwc = jnp.transpose(x, (0, 2, 3, 1))
    # transposed conv == lhs-dilated conv with spatially flipped kernel
    w_hwio = jnp.transpose(weight[:, :, ::-1, ::-1], (2, 3, 0, 1))
    y = jax.lax.conv_general_dilated(
        x_nhwc, w_hwio.astype(jnp.float32), window_strides=(1, 1),
        padding=((2, 2), (2, 2)), lhs_dilation=(2, 2),
        dimension_numbers=("NHWC", "HWIO", "NHWC"))
    y = y + bias[None, None, None, :]
    mean = jnp.mean(y, axis=(1, 2), keepdims=True)
    var = jnp.mean(jnp.square(y - mean), axis=(1, 2), keepdims=True)
    y = (y - mean) * jax.lax.rsqrt(var + eps)
    return jnp.transpose(y, (0, 3, 1, 2))


if __name__ == "__main__":
    N, in_ch, out_ch, H, W = 2, 4, 8, 16, 16

    key = jax.random.PRNGKey(0)
    kx, kw, kb = jax.random.split(key, 3)
    x = jax.random.normal(kx, (N, in_ch, H, W), jnp.float32)
    bound = 1.0 / (in_ch * 4 * 4) ** 0.5
    weight = jax.random.uniform(kw, (in_ch, out_ch, 4, 4), jnp.float32, -bound, bound)
    bias = jax.random.uniform(kb, (out_ch,), jnp.float32, -bound, bound)

    out = jax.jit(up_2d_forward)(x, weight, bias)
    out = jax.block_until_ready(out)

    ref = _reference(x, weight, bias)
    assert out.shape == (N, out_ch, 2 * H, 2 * W), out.shape
    assert jnp.allclose(out, ref, atol=1e-4, rtol=1e-4), float(
        jnp.max(jnp.abs(out - ref)))

    print("KERNEL_OK")
</pallas_src>

<mosaic_0001>
module attributes {stable_mosaic.version = 11 : i64} {
  func.func @_up2d_kernel(%arg0: i32, %arg1: memref<1x16x16x4xf32, #tpu.memory_space<vmem>>, %arg2: memref<3x3x4x32xf32, #tpu.memory_space<vmem>>, %arg3: memref<1x16x16x32xf32, #tpu.memory_space<vmem>>, %arg4: memref<18x18x4xf32, #tpu.memory_space<vmem>>) attributes {dimension_semantics = [#tpu.dimension_semantics<parallel>], iteration_bounds = array<i64: 2>, scalar_prefetch = 0 : i64, scratch_operands = 1 : i64, tpu.core_type = #tpu.core_type<tc>, window_params = [{transform_indices = @transform_0, window_bounds = array<i64: 1, 16, 16, 4>}, {pipeline_mode = #tpu.pipeline_mode<synchronous>, transform_indices = @transform_1, window_bounds = array<i64: 3, 3, 4, 32>}, {transform_indices = @transform_2, window_bounds = array<i64: 1, 16, 16, 32>}]} {
    %cst = arith.constant 0.000000e+00 : f32
    %0 = vector.broadcast %cst : f32 to vector<18x18x4xf32>
    %c0 = arith.constant 0 : index
    %c0_0 = arith.constant 0 : index
    %c0_1 = arith.constant 0 : index
    %1 = vector.load %arg4[%c0, %c0_0, %c0_1] : memref<18x18x4xf32, #tpu.memory_space<vmem>>, vector<18x18x4xf32>
    tpu.vector_store %arg4[%c0, %c0_0, %c0_1], %0 {strides = array<i32>} : memref<18x18x4xf32, #tpu.memory_space<vmem>>, vector<18x18x4xf32>,
    %c0_2 = arith.constant 0 : index
    %c0_3 = arith.constant 0 : index
    %c0_4 = arith.constant 0 : index
    %c0_5 = arith.constant 0 : index
    %2 = vector.load %arg1[%c0_2, %c0_3, %c0_4, %c0_5] : memref<1x16x16x4xf32, #tpu.memory_space<vmem>>, vector<1x16x16x4xf32>
    %3 = vector.shape_cast %2 : vector<1x16x16x4xf32> to vector<16x16x4xf32>
    %cst_6 = arith.constant 0.000000e+00 : f32
    %4 = vector.broadcast %cst_6 : f32 to vector<16x16x4xf32>
    %5 = arith.maximumf %3, %4 : vector<16x16x4xf32>
    %c1 = arith.constant 1 : index
    %c1_7 = arith.constant 1 : index
    %c0_8 = arith.constant 0 : index
    %6 = vector.load %arg4[%c1, %c1_7, %c0_8] : memref<18x18x4xf32, #tpu.memory_space<vmem>>, vector<16x16x4xf32>
    tpu.vector_store %arg4[%c1, %c1_7, %c0_8], %5 {strides = array<i32>} : memref<18x18x4xf32, #tpu.memory_space<vmem>>, vector<16x16x4xf32>,
    %cst_9 = arith.constant 0.000000e+00 : f32
    %7 = vector.broadcast %cst_9 : f32 to vector<16x16x32xf32>
    %c0_10 = arith.constant 0 : index
    %c0_11 = arith.constant 0 : index
    %c0_12 = arith.constant 0 : index
    %8 = vector.load %arg4[%c0_10, %c0_11, %c0_12] : memref<18x18x4xf32, #tpu.memory_space<vmem>>, vector<16x16x4xf32>
    %c0_13 = arith.constant 0 : index
    %c0_14 = arith.constant 0 : index
    %c0_15 = arith.constant 0 : index
    %c0_16 = arith.constant 0 : index
    %9 = vector.load %arg2[%c0_13, %c0_14, %c0_15, %c0_16] : memref<3x3x4x32xf32, #tpu.memory_space<vmem>>, vector<1x1x4x32xf32>
    %10 = vector.shape_cast %9 : vector<1x1x4x32xf32> to vector<4x32xf32>
    %cst_17 = arith.constant dense<0.000000e+00> : vector<16x16x32xf32>
    %11 = tpu.matmul %8, %10, %cst_17 {dimension_numbers = #tpu.dot_dimension_numbers<[2], [0], [0, 1], [1], [0, 0, 0, 1, 1, 1], [], []>} : vector<16x16x4xf32>, vector<4x32xf32>, vector<16x16x32xf32> -> vector<16x16x32xf32>
    %12 = arith.addf %7, %11 : vector<16x16x32xf32>
    %c0_18 = arith.constant 0 : index
    %c1_19 = arith.constant 1 : index
    %c0_20 = arith.constant 0 : index
    %13 = vector.load %arg4[%c0_18, %c1_19, %c0_20] : memref<18x18x4xf32, #tpu.memory_space<vmem>>, vector<16x16x4xf32>
    %c0_21 = arith.constant 0 : index
    %c1_22 = arith.constant 1 : index
    %c0_23 = arith.constant 0 : index
    %c0_24 = arith.constant 0 : index
    %14 = vector.load %arg2[%c0_21, %c1_22, %c0_23, %c0_24] : memref<3x3x4x32xf32, #tpu.memory_space<vmem>>, vector<1x1x4x32xf32>
    %15 = vector.shape_cast %14 : vector<1x1x4x32xf32> to vector<4x32xf32>
    %cst_25 = arith.constant dense<0.000000e+00> : vector<16x16x32xf32>
    %16 = tpu.matmul %13, %15, %cst_25 {dimension_numbers = #tpu.dot_dimension_numbers<[2], [0], [0, 1], [1], [0, 0, 0, 1, 1, 1], [], []>} : vector<16x16x4xf32>, vector<4x32xf32>, vector<16x16x32xf32> -> vector<16x16x32xf32>
    %17 = arith.addf %12, %16 : vector<16x16x32xf32>
    %c0_26 = arith.constant 0 : index
    %c2 = arith.constant 2 : index
    %c0_27 = arith.constant 0 : index
    %18 = vector.load %arg4[%c0_26, %c2, %c0_27] : memref<18x18x4xf32, #tpu.memory_space<vmem>>, vector<16x16x4xf32>
    %c0_28 = arith.constant 0 : index
    %c2_29 = arith.constant 2 : index
    %c0_30 = arith.constant 0 : index
    %c0_31 = arith.constant 0 : index
    %19 = vector.load %arg2[%c0_28, %c2_29, %c0_30, %c0_31] : memref<3x3x4x32xf32, #tpu.memory_space<vmem>>, vector<1x1x4x32xf32>
    %20 = vector.shape_cast %19 : vector<1x1x4x32xf32> to vector<4x32xf32>
    %cst_32 = arith.constant dense<0.000000e+00> : vector<16x16x32xf32>
    %21 = tpu.matmul %18, %20, %cst_32 {dimension_numbers = #tpu.dot_dimension_numbers<[2], [0], [0, 1], [1], [0, 0, 0, 1, 1, 1], [], []>} : vector<16x16x4xf32>, vector<4x32xf32>, vector<16x16x32xf32> -> vector<16x16x32xf32>
    %22 = arith.addf %17, %21 : vector<16x16x32xf32>
    %c1_33 = arith.constant 1 : index
    %c0_34 = arith.constant 0 : index
    %c0_35 = arith.constant 0 : index
    %23 = vector.load %arg4[%c1_33, %c0_34, %c0_35] : memref<18x18x4xf32, #tpu.memory_space<vmem>>, vector<16x16x4xf32>
    %c1_36 = arith.constant 1 : index
    %c0_37 = arith.constant 0 : index
    %c0_38 = arith.constant 0 : index
    %c0_39 = arith.constant 0 : index
    %24 = vector.load %arg2[%c1_36, %c0_37, %c0_38, %c0_39] : memref<3x3x4x32xf32, #tpu.memory_space<vmem>>, vector<1x1x4x32xf32>
    %25 = vector.shape_cast %24 : vector<1x1x4x32xf32> to vector<4x32xf32>
    %cst_40 = arith.constant dense<0.000000e+00> : vector<16x16x32xf32>
    %26 = tpu.matmul %23, %25, %cst_40 {dimension_numbers = #tpu.dot_dimension_numbers<[2], [0], [0, 1], [1], [0, 0, 0, 1, 1, 1], [], []>} : vector<16x16x4xf32>, vector<4x32xf32>, vector<16x16x32xf32> -> vector<16x16x32xf32>
    %27 = arith.addf %22, %26 : vector<16x16x32xf32>
    %c1_41 = arith.constant 1 : index
    %c1_42 = arith.constant 1 : index
    %c0_43 = arith.constant 0 : index
    %28 = vector.load %arg4[%c1_41, %c1_42, %c0_43] : memref<18x18x4xf32, #tpu.memory_space<vmem>>, vector<16x16x4xf32>
    %c1_44 = arith.constant 1 : index
    %c1_45 = arith.constant 1 : index
    %c0_46 = arith.constant 0 : index
    %c0_47 = arith.constant 0 : index
    %29 = vector.load %arg2[%c1_44, %c1_45, %c0_46, %c0_47] : memref<3x3x4x32xf32, #tpu.memory_space<vmem>>, vector<1x1x4x32xf32>
    %30 = vector.shape_cast %29 : vector<1x1x4x32xf32> to vector<4x32xf32>
    %cst_48 = arith.constant dense<0.000000e+00> : vector<16x16x32xf32>
    %31 = tpu.matmul %28, %30, %cst_48 {dimension_numbers = #tpu.dot_dimension_numbers<[2], [0], [0, 1], [1], [0, 0, 0, 1, 1, 1], [], []>} : vector<16x16x4xf32>, vector<4x32xf32>, vector<16x16x32xf32> -> vector<16x16x32xf32>
    %32 = arith.addf %27, %31 : vector<16x16x32xf32>
    %c1_49 = arith.constant 1 : index
    %c2_50 = arith.constant 2 : index
    %c0_51 = arith.constant 0 : index
    %33 = vector.load %arg4[%c1_49, %c2_50, %c0_51] : memref<18x18x4xf32, #tpu.memory_space<vmem>>, vector<16x16x4xf32>
    %c1_52 = arith.constant 1 : index
    %c2_53 = arith.constant 2 : index
    %c0_54 = arith.constant 0 : index
    %c0_55 = arith.constant 0 : index
    %34 = vector.load %arg2[%c1_52, %c2_53, %c0_54, %c0_55] : memref<3x3x4x32xf32, #tpu.memory_space<vmem>>, vector<1x1x4x32xf32>
    %35 = vector.shape_cast %34 : vector<1x1x4x32xf32> to vector<4x32xf32>
    %cst_56 = arith.constant dense<0.000000e+00> : vector<16x16x32xf32>
    %36 = tpu.matmul %33, %35, %cst_56 {dimension_numbers = #tpu.dot_dimension_numbers<[2], [0], [0, 1], [1], [0, 0, 0, 1, 1, 1], [], []>} : vector<16x16x4xf32>, vector<4x32xf32>, vector<16x16x32xf32> -> vector<16x16x32xf32>
    %37 = arith.addf %32, %36 : vector<16x16x32xf32>
    %c2_57 = arith.constant 2 : index
    %c0_58 = arith.constant 0 : index
    %c0_59 = arith.constant 0 : index
    %38 = vector.load %arg4[%c2_57, %c0_58, %c0_59] : memref<18x18x4xf32, #tpu.memory_space<vmem>>, vector<16x16x4xf32>
    %c2_60 = arith.constant 2 : index
    %c0_61 = arith.constant 0 : index
    %c0_62 = arith.constant 0 : index
    %c0_63 = arith.constant 0 : index
    %39 = vector.load %arg2[%c2_60, %c0_61, %c0_62, %c0_63] : memref<3x3x4x32xf32, #tpu.memory_space<vmem>>, vector<1x1x4x32xf32>
    %40 = vector.shape_cast %39 : vector<1x1x4x32xf32> to vector<4x32xf32>
    %cst_64 = arith.constant dense<0.000000e+00> : vector<16x16x32xf32>
    %41 = tpu.matmul %38, %40, %cst_64 {dimension_numbers = #tpu.dot_dimension_numbers<[2], [0], [0, 1], [1], [0, 0, 0, 1, 1, 1], [], []>} : vector<16x16x4xf32>, vector<4x32xf32>, vector<16x16x32xf32> -> vector<16x16x32xf32>
    %42 = arith.addf %37, %41 : vector<16x16x32xf32>
    %c2_65 = arith.constant 2 : index
    %c1_66 = arith.constant 1 : index
    %c0_67 = arith.constant 0 : index
    %43 = vector.load %arg4[%c2_65, %c1_66, %c0_67] : memref<18x18x4xf32, #tpu.memory_space<vmem>>, vector<16x16x4xf32>
    %c2_68 = arith.constant 2 : index
    %c1_69 = arith.constant 1 : index
    %c0_70 = arith.constant 0 : index
    %c0_71 = arith.constant 0 : index
    %44 = vector.load %arg2[%c2_68, %c1_69, %c0_70, %c0_71] : memref<3x3x4x32xf32, #tpu.memory_space<vmem>>, vector<1x1x4x32xf32>
    %45 = vector.shape_cast %44 : vector<1x1x4x32xf32> to vector<4x32xf32>
    %cst_72 = arith.constant dense<0.000000e+00> : vector<16x16x32xf32>
    %46 = tpu.matmul %43, %45, %cst_72 {dimension_numbers = #tpu.dot_dimension_numbers<[2], [0], [0, 1], [1], [0, 0, 0, 1, 1, 1], [], []>} : vector<16x16x4xf32>, vector<4x32xf32>, vector<16x16x32xf32> -> vector<16x16x32xf32>
    %47 = arith.addf %42, %46 : vector<16x16x32xf32>
    %c2_73 = arith.constant 2 : index
    %c2_74 = arith.constant 2 : index
    %c0_75 = arith.constant 0 : index
    %48 = vector.load %arg4[%c2_73, %c2_74, %c0_75] : memref<18x18x4xf32, #tpu.memory_space<vmem>>, vector<16x16x4xf32>
    %c2_76 = arith.constant 2 : index
    %c2_77 = arith.constant 2 : index
    %c0_78 = arith.constant 0 : index
    %c0_79 = arith.constant 0 : index
    %49 = vector.load %arg2[%c2_76, %c2_77, %c0_78, %c0_79] : memref<3x3x4x32xf32, #tpu.memory_space<vmem>>, vector<1x1x4x32xf32>
    %50 = vector.shape_cast %49 : vector<1x1x4x32xf32> to vector<4x32xf32>
    %cst_80 = arith.constant dense<0.000000e+00> : vector<16x16x32xf32>
    %51 = tpu.matmul %48, %50, %cst_80 {dimension_numbers = #tpu.dot_dimension_numbers<[2], [0], [0, 1], [1], [0, 0, 0, 1, 1, 1], [], []>} : vector<16x16x4xf32>, vector<4x32xf32>, vector<16x16x32xf32> -> vector<16x16x32xf32>
    %52 = arith.addf %47, %51 : vector<16x16x32xf32>
    %53 = tpu.iota {dimensions = array<i32: 0>} : vector<32x32xi32>
    %54 = tpu.iota {dimensions = array<i32: 1>} : vector<32x32xi32>
    %c8_i32 = arith.constant 8 : i32
    %c0_i32 = arith.constant 0 : i32
    %55 = arith.cmpi eq, %c8_i32, %c0_i32 : i32
    %c1_i32 = arith.constant 1 : i32
    %56 = arith.select %55, %c1_i32, %c8_i32 : i32
    %57 = vector.broadcast %56 : i32 to vector<32x32xi32>
    %58 = arith.remsi %53, %57 : vector<32x32xi32>
    %c0_i32_81 = arith.constant 0 : i32
    %59 = vector.broadcast %c0_i32_81 : i32 to vector<32x32xi32>
    %60 = arith.cmpi ne, %58, %59 : vector<32x32xi32>
    %c0_i32_82 = arith.constant 0 : i32
    %61 = vector.broadcast %c0_i32_82 : i32 to vector<32x32xi32>
    %62 = arith.cmpi slt, %58, %61 : vector<32x32xi32>
    %c0_i32_83 = arith.constant 0 : i32
    %63 = arith.cmpi slt, %56, %c0_i32_83 : i32
    %64 = vector.broadcast %63 : i1 to vector<32x32xi1>
    %65 = vector.broadcast %64 : vector<32x32xi1> to vector<32x32xi1>
    %66 = arith.xori %62, %65 : vector<32x32xi1>
    %67 = arith.andi %66, %60 : vector<32x32xi1>
    %68 = vector.broadcast %56 : i32 to vector<32x32xi32>
    %69 = arith.addi %58, %68 : vector<32x32xi32>
    %70 = arith.select %67, %69, %58 : vector<32x32xi1>, vector<32x32xi32>
    %c8_i32_84 = arith.constant 8 : i32
    %c0_i32_85 = arith.constant 0 : i32
    %71 = arith.cmpi eq, %c8_i32_84, %c0_i32_85 : i32
    %c1_i32_86 = arith.constant 1 : i32
    %72 = arith.select %71, %c1_i32_86, %c8_i32_84 : i32
    %73 = vector.broadcast %72 : i32 to vector<32x32xi32>
    %74 = arith.remsi %54, %73 : vector<32x32xi32>
    %c0_i32_87 = arith.constant 0 : i32
    %75 = vector.broadcast %c0_i32_87 : i32 to vector<32x32xi32>
    %76 = arith.cmpi ne, %74, %75 : vector<32x32xi32>
    %c0_i32_88 = arith.constant 0 : i32
    %77 = vector.broadcast %c0_i32_88 : i32 to vector<32x32xi32>
    %78 = arith.cmpi slt, %74, %77 : vector<32x32xi32>
    %c0_i32_89 = arith.constant 0 : i32
    %79 = arith.cmpi slt, %72, %c0_i32_89 : i32
    %80 = vector.broadcast %79 : i1 to vector<32x32xi1>
    %81 = vector.broadcast %80 : vector<32x32xi1> to vector<32x32xi1>
    %82 = arith.xori %78, %81 : vector<32x32xi1>
    %83 = arith.andi %82, %76 : vector<32x32xi1>
    %84 = vector.broadcast %72 : i32 to vector<32x32xi32>
    %85 = arith.addi %74, %84 : vector<32x32xi32>
    %86 = arith.select %83, %85, %74 : vector<32x32xi1>, vector<32x32xi32>
    %87 = arith.cmpi eq, %70, %86 : vector<32x32xi32>
    %88 = arith.extui %87 : vector<32x32xi1> to vector<32x32xi32>
    %89 = arith.sitofp %88 : vector<32x32xi32> to vector<32x32xf32>
    %cst_90 = arith.constant dense<0.000000e+00> : vector<32xf32>
    %90 = vector.multi_reduction <add>, %52, %cst_90 [0, 1] : vector<16x16x32xf32> to vector<32xf32>
    %91 = vector.shape_cast %90 : vector<32xf32> to vector<1x1x32xf32>
    %cst_91 = arith.constant dense<0.000000e+00> : vector<1x1x32xf32>
    %92 = tpu.matmul %91, %89, %cst_91 {dimension_numbers = #tpu.dot_dimension_numbers<[2], [0], [0, 1], [1], [0, 0, 0, 1, 1, 1], [], []>} : vector<1x1x32xf32>, vector<32x32xf32>, vector<1x1x32xf32> -> vector<1x1x32xf32>
    %cst_92 = arith.constant 9.765625E-4 : f32
    %93 = vector.broadcast %cst_92 : f32 to vector<1x1x32xf32>
    %94 = arith.mulf %92, %93 : vector<1x1x32xf32>
    %95 = vector.broadcast %94 : vector<1x1x32xf32> to vector<16x16x32xf32>
    %96 = arith.subf %52, %95 : vector<16x16x32xf32>
    %97 = arith.mulf %96, %96 : vector<16x16x32xf32>
    %cst_93 = arith.constant dense<0.000000e+00> : vector<32xf32>
    %98 = vector.multi_reduction <add>, %97, %cst_93 [0, 1] : vector<16x16x32xf32> to vector<32xf32>
    %99 = vector.shape_cast %98 : vector<32xf32> to vector<1x1x32xf32>
    %cst_94 = arith.constant dense<0.000000e+00> : vector<1x1x32xf32>
    %100 = tpu.matmul %99, %89, %cst_94 {dimension_numbers = #tpu.dot_dimension_numbers<[2], [0], [0, 1], [1], [0, 0, 0, 1, 1, 1], [], []>} : vector<1x1x32xf32>, vector<32x32xf32>, vector<1x1x32xf32> -> vector<1x1x32xf32>
    %cst_95 = arith.constant 9.765625E-4 : f32
    %101 = vector.broadcast %cst_95 : f32 to vector<1x1x32xf32>
    %102 = arith.mulf %100, %101 : vector<1x1x32xf32>
    %cst_96 = arith.constant 9.99999974E-6 : f32
    %103 = vector.broadcast %cst_96 : f32 to vector<1x1x32xf32>
    %104 = arith.addf %102, %103 : vector<1x1x32xf32>
    %105 = math.rsqrt %104 : vector<1x1x32xf32>
    %106 = vector.broadcast %105 : vector<1x1x32xf32> to vector<16x16x32xf32>
    %107 = arith.mulf %96, %106 : vector<16x16x32xf32>
    %108 = vector.shape_cast %107 : vector<16x16x32xf32> to vector<1x16x16x32xf32>
    %c0_97 = arith.constant 0 : index
    %c0_98 = arith.constant 0 : index
    %c0_99 = arith.constant 0 : index
    %c0_100 = arith.constant 0 : index
    %109 = vector.load %arg3[%c0_97, %c0_98, %c0_99, %c0_100] : memref<1x16x16x32xf32, #tpu.memory_space<vmem>>, vector<1x16x16x32xf32>
    tpu.vector_store %arg3[%c0_97, %c0_98, %c0_99, %c0_100], %108 {strides = array<i32>} : memref<1x16x16x32xf32, #tpu.memory_space<vmem>>, vector<1x16x16x32xf32>,
    return
  }
  func.func @transform_0(%arg0: i32) -> (i32, i32, i32, i32) {
    %c0_i32 = arith.constant 0 : i32
    %c0_i32_0 = arith.constant 0 : i32
    %c0_i32_1 = arith.constant 0 : i32
    %c0_i32_2 = arith.constant 0 : i32
    return %arg0, %c0_i32, %c0_i32_0, %c0_i32_1 : i32, i32, i32, i32
  }
  func.func @transform_1(%arg0: i32) -> (i32, i32, i32, i32) {
    %c0_i32 = arith.constant 0 : i32
    %c0_i32_0 = arith.constant 0 : i32
    %c0_i32_1 = arith.constant 0 : i32
    %c0_i32_2 = arith.constant 0 : i32
    %c0_i32_3 = arith.constant 0 : i32
    return %c0_i32, %c0_i32_0, %c0_i32_1, %c0_i32_2 : i32, i32, i32, i32
  }
  func.func @transform_2(%arg0: i32) -> (i32, i32, i32, i32) {
    %c0_i32 = arith.constant 0 : i32
    %c0_i32_0 = arith.constant 0 : i32
    %c0_i32_1 = arith.constant 0 : i32
    %c0_i32_2 = arith.constant 0 : i32
    return %arg0, %c0_i32, %c0_i32_0, %c0_i32_1 : i32, i32, i32, i32
  }
}

</mosaic_0001>

<bundles_post_ra>
// kernel: up_2d_forward.1
= control target key start
LH: loop header
LB: loop body
LE: loop exit
PB: predicated region body
PF: predicated region fallthrough
CT: control target
= control target key end

     0   :  { %7 = vsyncpa [#allocation4], 0  ;;  %s7692_s0 = inlined_call_operand.hbm [shape: f32[2,16,16,4], index: 0, kind: input, shape index: {}]   ;;  %s7693_s1 = inlined_call_operand.hbm [shape: f32[3,3,4,32], index: 1, kind: input, shape index: {}]   ;;  %s7694_s2 = inlined_call_operand.hbm [shape: f32[2,16,16,32], index: 2, kind: output, shape index: {}]  }
   0x1   :  { %9 = vsyncpa [#allocation4 + $0x1], 0 }
   0x2   :  { %10 = vsyncpa [#allocation7], 0 }
   0x3   :  { %11 = vsyncpa [#allocation5], 0 }
   0x4   :  { %13 = vsyncpa [#allocation5 + $0x1], 0  ;;  %s5983_s9 = smov 0   ;;  %s5985_s10 = smov 0  }
   0x5   :  { %s5987_s11 = smov 0   ;;  %s5989_s12 = smov 0  }
   0x6 LB: > { %s6004_s13 = sadd.s32 4294967295, %s5953_s12   ;;  %s4378_s14 = sadd.s32 4294967294, %s5953_s12   ;;  %s5953_s12 = sphi %s5989_s12, %s7829_s12   ;;  %s5949_s11 = sphi %s5987_s11, %s7828_s11   ;;  %s5945_s10 = sphi %s5985_s10, %s7827_s10   ;;  %s5941_s9 = sphi %s5983_s9, %s7826_s9  }
   0x7   : > { %p39_p0 = scmp.ne.s32.totalorder %s5945_s10, %s5941_s9  ;;  %p7695_p1 = scmp.eq.s32.totalorder %s6004_s13, 0 }
   0x8   : > { %p90_p3 = scmp.eq.s32.totalorder %s4378_s14, 1  ;;  %p4379_p5 = scmp.ge.s32.totalorder %s5953_s12, 1 }
   0x9   : > { %p6013_p4 = por %p7695_p1, %p39_p0  ;;  %p97_p7 = scmp.lt.s32.totalorder %s5953_s12, 3 }
   0xa   : > { %p6018_p6 = por %p90_p3, %p39_p0  ;;  %s5955_s18 = smov [#allocation6]  }
   0xb   : > { %s7742_s15 = scalar_select %p6013_p4, 1, 0 }
   0xc   : > { %s7743_s16 = scalar_select %p6018_p6, 1, 0 }
   0xd   : > { %p6023_p8 = pnand %p4379_p5, %p97_p7  ;;  %s109_s19 = sshll.u32 %s5955_s18, 4  ;;  %s6027_s19 = int_to_ptr.vmem [resolvable:$true] %s109_s19 }
   0xe   : > { %s6039_s21 = sadd.s32 1, %s5953_s12   ;;  %s26_s22 = sadd.s32 1, %s5949_s11 }
   0xf   : > { %s7744_s17 = scalar_select %p6023_p8, 1, 0 }
  0x10   : > { %p5764_p9 = pneg %p6023_p8  ;;  %s23_s23 = ssub.s32 %s5953_s12, %s6039_s21 }
  0x11   : > { %s5825_s26 = scalar_lea.hbm %s7693_s1, 576 }
  0x12   : > { %p6034_p11 = pnand %p5764_p9, %p7695_p1  ;;  %p5826_p12 = scmp.ne.s32.totalorder %s7693_s1, %s5825_s26 }
  0x13   : > { %p5832_p5 = scmp.lt.u32.totalorder %s5825_s26, %s7693_s1 }
  0x14   : > { %p5827_p13 = pneg %p6034_p11 }
  0x16   : > { %p5828_p0 = pnand %p5827_p13, %p5826_p12 }
  0x18   : > { %p5829_p3 = pneg %p5828_p0 }
  0x1a   : > { %p5834_p7 = pnand %p5832_p5, %p5829_p3 }
  0x1c   : > { %5837 = shalt.err (!%p5834_p7)
}
  0x1d   : > { %s5838_s3 = scalar_lea.vmem %s6027_s19, 576  ;;  %p5846_p2 = scmp.lt.s32.totalorder %s6027_s19, %s6027_s19 }
  0x1e   : > { %p5839_p9 = scmp.ne.s32.totalorder %s6027_s19, %s5838_s3  ;;  %p5847_p6 = scmp.lt.s32.totalorder %s5838_s3, %s5838_s3 }
  0x20   : > { %p5841_p10 = pnand %p5839_p9, %p5827_p13  ;;  %p5848_p4 = por %p5847_p6, %p5846_p2 }
  0x22   : > { %p5842_p1 = pneg %p5841_p10 }
  0x24   : > { %p5849_p8 = pnand %p5848_p4, %p5842_p1 }
  0x26   : > { %5852 = shalt.err (!%p5849_p8)
}
  0x27   : > { %s5956_s4 = smov 64   ;;  %s5957_s5 = smov 4  }
  0x28   : > { %5767 = dma.hbm_to_vmem [thread:$0]  (!%p6034_p11), %s7693_s1, 576, %s6027_s19, [#allocation7], %s5956_s4, %s5956_s4, %s5957_s5  }
  0x29   : > { %p24_p2 = scmp.eq.s32.totalorder %s23_s23, 0  ;;  %p33_p1 = scmp.ne.s32.totalorder %s5949_s11, %s5945_s10 }
  0x2a   : > { %p34_p4 = scmp.eq.s32.totalorder %s5953_s12, 0  ;;  %p5777_p6 = scmp.lt.s32.totalorder %s5953_s12, 2 }
  0x2b   : > { %s6070_s8 = scalar_select %p24_p2, %s5949_s11, %s26_s22  }
  0x2c   : > { %p35_p8 = por %p34_p4, %p33_p1  ;;  %p7746_p10 = scmp.eq.s32.totalorder %s6004_s13, 1 }
  0x2d   : > { %s123_s18 = sand.u32 1, %s5949_s11   ;;  %s4705_s24 = sshll.u32 %s5953_s12, 12 }
  0x2e   : > { %p6074_p12 = por %p7746_p10, %p33_p1  ;;  %s4382_s25 = sshll.u32 %s123_s18, 8 }
  0x2f   : > { %s6083_s27 = scalar_lea.hbm %s7692_s0, %s4705_s24  ;;  %s127_s19 = scalar_lea.vmem [#allocation3], %s4382_s25 }
  0x30   : > { %s134_s22 = sshll.u32 %s127_s19, 4  ;;  %p6085_p11 = pnand %p5777_p6, %p35_p8  ;;  %s6089_s22 = int_to_ptr.vmem [resolvable:$true] %s134_s22 }
  0x31   : > { %s6091_s28 = scalar_lea.sflag [#allocation4], %s123_s18  ;;  %s5853_s29 = scalar_lea.hbm %s6083_s27, 4096 }
  0x32   : > { %p5854_p13 = scmp.ne.s32.totalorder %s6083_s27, %s5853_s29  ;;  %p5855_p0 = pneg %p6085_p11 }
  0x33   : > { %s5858_s4 = scalar_lea.hbm %s7692_s0, 8192  ;;  %p5859_p7 = scmp.lt.u32.totalorder %s6083_s27, %s7692_s0 }
  0x34   : > { %p5856_p3 = pnand %p5855_p0, %p5854_p13  ;;  %p5860_p9 = scmp.lt.u32.totalorder %s5858_s4, %s5853_s29 }
  0x35   : > { %p5862_p1 = scmp.lt.u32.totalorder %s5853_s29, %s6083_s27 }
  0x36   : > { %p5857_p5 = pneg %p5856_p3  ;;  %p5861_p2 = por %p5860_p9, %p5859_p7 }
  0x38   : > { %p5863_p4 = por %p5862_p1, %p5861_p2 }
  0x3a   : > { %p5864_p6 = pnand %p5863_p4, %p5857_p5 }
  0x3c   : > { %5867 = shalt.err (!%p5864_p6)
}
  0x3d   : > { %s5868_s7 = scalar_lea.vmem %s6089_s22, 4096  ;;  %s5958_s18 = smov [#allocation3]  }
  0x3e   : > { %p5869_p8 = scmp.ne.s32.totalorder %s6089_s22, %s5868_s7  ;;  %s5873_s24 = sshll.u32 %s5958_s18, 4  ;;  %s5874_s24 = int_to_ptr.vmem [resolvable:$false] %s5873_s24 }
  0x3f   : > { %s5875_s25 = scalar_lea.vmem %s5874_s24, 8192  ;;  %p5876_p3 = scmp.lt.s32.totalorder %s6089_s22, %s5874_s24 }
  0x40   : > { %p5871_p10 = pnand %p5869_p8, %p5855_p0  ;;  %p5877_p7 = scmp.lt.s32.totalorder %s5875_s25, %s5868_s7 }
  0x42   : > { %p5872_p13 = pneg %p5871_p10  ;;  %p5878_p9 = por %p5877_p7, %p5876_p3 }
  0x44   : > { %p5879_p2 = pnand %p5878_p9, %p5872_p13 }
  0x46   : > { %5882 = shalt.err (!%p5879_p2)
}
  0x47   : > { %s5959_s20 = smov 128   ;;  %s5960_s26 = smov 8  }
  0x48   : > { %5771 = dma.hbm_to_vmem [thread:$0]  (!%p6085_p11), %s6083_s27, 4096, %s6089_s22, %s6091_s28, %s5959_s20, %s5959_s20, %s5960_s26  }
  0x49   : > { %p7749_p0 = scmp.ne.s32.totalorder %s7744_s17, 0 }
  0x4b   : > { %146 = sbr.rel (%p7749_p0) target bundleno = 1207 (0x4b7), region = 28 }
  0x52   : > { %s6122_s19 = sand.u32 1, %s5945_s10   ;;  %p7750_p5 = scmp.ne.s32.totalorder %s7742_s15, 0 }
  0x53   : > { %s4386_s29 = sshll.u32 %s6122_s19, 8  ;;  %s149_s30 = scalar_lea.sflag [#allocation4], %s6122_s19 }
  0x54   : > { %s6128_s3 = scalar_lea.vmem [#allocation3], %s4386_s29 }
  0x55   : > { %5928 = dma.done.wait (%p7750_p5), %s149_s30, 4096  }
  0x56   : > { %5930 = vsyncadd (%p7750_p5), %s149_s30, 4294963200  ;;  %p7751_p11 = scmp.eq.s32.totalorder %s6004_s13, 0 }
  0x58   : > { %5932 = dma.done.wait (%p7751_p11), [#allocation7], 576   ;;  %p7752_p1 = pmov %p7751_p11 }
  0x59   : > { %vm177_vm0 = vcmask 31744   ;;  %vm180_vm1 = vcmask 25600   ;;  %v7698_v0 = vmov 0.0   ;;  %vm493_vm2 = vcmask 1043456   ;;  %v396_v1 = vld [vmem:[#allocation6 + $0x4] sm:$0xf] }
  0x5a   : > { %5934 = vsyncadd (%p7752_p1), [#allocation7], 4294966720  ;;  %178 = vst.msk [vmem:[#allocation2] sm:$0xff] %vm177_vm0, %v7698_v0  ;;  %v6246_v2 = vld [vmem:[#allocation6 + $0x10] sm:$0xf]  ;;  %v233_v3 = vld [vmem:[%s6128_s3] sm:$0xff]  ;;  %5014 = vmatprep.subr.msk.mxu1 %vm493_vm2, %v396_v1 }
  0x5b   : > { %179 = vst.msk [vmem:[#allocation2 + $0x8] sm:$0xff] %vm177_vm0, %v7698_v0  ;;  %182 = vst.msk [vmem:[#allocation2 + $0x18] sm:$0xff] %vm177_vm0, %v7698_v0  ;;  %5214 = vmatprep.subr.msk.mxu0 %vm493_vm2, %v6246_v2  ;;  %v265_v6 = vmax.f32 %v233_v3, 0.0  ;;  %v6252_v7 = vld [vmem:[#allocation6 + $0x14] sm:$0xf]  ;;  %5015 = vmatpush3.msk.msra.mxu1 %vm493_vm2, %v396_v1  ;;  %v234_v8 = vld [vmem:[%s6128_s3 + $0x8] sm:$0xff] }
  0x5c   : > { %183 = vst.msk [vmem:[#allocation2 + $0x20] sm:$0xff] %vm177_vm0, %v7698_v0  ;;  %185 = vst.msk [vmem:[#allocation2 + $0x30] sm:$0xff] %vm177_vm0, %v7698_v0  ;;  %v235_v9 = vld [vmem:[%s6128_s3 + $0x10] sm:$0xff]  ;;  %v236_v10 = vld [vmem:[%s6128_s3 + $0x18] sm:$0xff]  ;;  %5215 = vmatpush3.msk.msra.mxu0 %vm493_vm2, %v6246_v2  ;;  %v266_v11 = vmax.f32 %v234_v8, 0.0  ;;  %vm5964_vm9 = vmmov 0  }
  0x5d   : > { %186 = vst.msk [vmem:[#allocation2 + $0x38] sm:$0xff] %vm177_vm0, %v7698_v0  ;;  %188 = vst.msk [vmem:[#allocation2 + $0x48] sm:$0xff] %vm177_vm0, %v7698_v0  ;;  %v267_v12 = vmax.f32 %v235_v9, 0.0  ;;  %v268_v13 = vmax.f32 %v236_v10, 0.0  ;;  %v237_v14 = vld [vmem:[%s6128_s3 + $0x20] sm:$0xff]  ;;  %v238_v15 = vld [vmem:[%s6128_s3 + $0x28] sm:$0xff]  ;;  %5264 = vmatprep.subr.msk.mxu0 %vm493_vm2, %v6252_v7 }
  0x5e   : > { %189 = vst.msk [vmem:[#allocation2 + $0x50] sm:$0xff] %vm177_vm0, %v7698_v0  ;;  %191 = vst.msk [vmem:[#allocation2 + $0x60] sm:$0xff] %vm177_vm0, %v7698_v0  ;;  %v239_v16 = vld [vmem:[%s6128_s3 + $0x30] sm:$0xff]  ;;  %v269_v17 = vmax.f32 %v237_v14, 0.0  ;;  %v270_v18 = vmax.f32 %v238_v15, 0.0  ;;  %v240_v20 = vld [vmem:[%s6128_s3 + $0x38] sm:$0xff] }
  0x5f   : > { %192 = vst.msk [vmem:[#allocation2 + $0x68] sm:$0xff] %vm177_vm0, %v7698_v0  ;;  %194 = vst.msk [vmem:[#allocation2 + $0x78] sm:$0xff] %vm177_vm0, %v7698_v0  ;;  %v271_v19 = vmax.f32 %v239_v16, 0.0  ;;  %v241_v21 = vld [vmem:[%s6128_s3 + $0x40] sm:$0xff]  ;;  %v242_v22 = vld [vmem:[%s6128_s3 + $0x48] sm:$0xff]  ;;  %v272_v23 = vmax.f32 %v240_v20, 0.0 }
  0x60   : > { %195 = vst.msk [vmem:[#allocation2 + $0x80] sm:$0xff] %vm177_vm0, %v7698_v0  ;;  %197 = vst.msk [vmem:[#allocation2 + $0x90] sm:$0xff] %vm177_vm0, %v7698_v0  ;;  %v273_v24 = vmax.f32 %v241_v21, 0.0  ;;  %v362_v25 = vld [vmem:[#allocation6] sm:$0xf]  ;;  %v274_v26 = vmax.f32 %v242_v22, 0.0 }
  0x61   : > { %198 = vst.msk [vmem:[#allocation2 + $0x98] sm:$0xff] %vm177_vm0, %v7698_v0  ;;  %200 = vst.msk [vmem:[#allocation2 + $0xa8] sm:$0xff] %vm177_vm0, %v7698_v0  ;;  %v243_v27 = vld [vmem:[%s6128_s3 + $0x50] sm:$0xff]  ;;  %5064 = vmatprep.subr.msk.mxu1 %vm493_vm2, %v362_v25  ;;  %v244_v29 = vld [vmem:[%s6128_s3 + $0x58] sm:$0xff]  ;;  %vm3856_vm10 = vcmask 261120   ;;  %s7555_s15 = scalar_lea.vmem [#allocation8], %s4386_s29 }
  0x62   : > { %201 = vst.msk [vmem:[#allocation2 + $0xb0] sm:$0xff] %vm177_vm0, %v7698_v0  ;;  %203 = vst.msk [vmem:[#allocation2 + $0xc0] sm:$0xff] %vm177_vm0, %v7698_v0  ;;  %v363_v4 = vld [vmem:[#allocation2 + $0x1] sm:$0xff]  ;;  %v275_v28 = vmax.f32 %v243_v27, 0.0  ;;  %v245_v30 = vld [vmem:[%s6128_s3 + $0x60] sm:$0xff]  ;;  %v276_v32 = vmax.f32 %v244_v29, 0.0 }
  0x63   : > { %204 = vst.msk [vmem:[#allocation2 + $0xc8] sm:$0xff] %vm177_vm0, %v7698_v0  ;;  %206 = vst.msk [vmem:[#allocation2 + $0xd8] sm:$0xff] %vm177_vm0, %v7698_v0  ;;  %5016 = vmatprep.mubr.msk.f32.mxu1 %vm177_vm0, %v363_v4  ;;  %v246_v31 = vld [vmem:[%s6128_s3 + $0x68] sm:$0xff]  ;;  %v277_v33 = vmax.f32 %v245_v30, 0.0  ;;  %v247_v35 = vld [vmem:[%s6128_s3 + $0x70] sm:$0xff]  ;;  %s4706_s17 = sshll.u32 %s6004_s13, 12 }
  0x64   : > { %207 = vst.msk [vmem:[#allocation2 + $0xe0] sm:$0xff] %vm177_vm0, %v7698_v0  ;;  %209 = vst.msk [vmem:[#allocation2 + $0xf0] sm:$0xff] %vm177_vm0, %v7698_v0  ;;  %v278_v34 = vmax.f32 %v246_v31, 0.0  ;;  %v248_v36 = vld [vmem:[%s6128_s3 + $0x78] sm:$0xff]  ;;  %v249_v37 = vld [vmem:[%s6128_s3 + $0x80] sm:$0xff]  ;;  %v279_v38 = vmax.f32 %v247_v35, 0.0  ;;  %s7618_s23 = scalar_lea.hbm %s7694_s2, %s4706_s17 }
  0x65   : > { %210 = vst.msk [vmem:[#allocation2 + $0xf8] sm:$0xff] %vm177_vm0, %v7698_v0  ;;  %212 = vst.msk [vmem:[#allocation2 + $0x108] sm:$0xff] %vm177_vm0, %v7698_v0  ;;  %v280_v39 = vmax.f32 %v248_v36, 0.0  ;;  %v281_v40 = vmax.f32 %v249_v37, 0.0  ;;  %v250_v41 = vld [vmem:[%s6128_s3 + $0x88] sm:$0xff]  ;;  %v251_v42 = vld [vmem:[%s6128_s3 + $0x90] sm:$0xff] }
  0x66   : > { %213 = vst.msk [vmem:[#allocation2 + $0x110] sm:$0xff] %vm177_vm0, %v7698_v0  ;;  %215 = vst.msk [vmem:[#allocation2 + $0x120] sm:$0xff] %vm177_vm0, %v7698_v0  ;;  %v252_v43 = vld [vmem:[%s6128_s3 + $0x98] sm:$0xff]  ;;  %v282_v44 = vmax.f32 %v250_v41, 0.0  ;;  %v283_v45 = vmax.f32 %v251_v42, 0.0  ;;  %v253_v47 = vld [vmem:[%s6128_s3 + $0xa0] sm:$0xff] }
  0x67   : > { %216 = vst.msk [vmem:[#allocation2 + $0x128] sm:$0xff] %vm177_vm0, %v7698_v0  ;;  %218 = vst.msk [vmem:[#allocation2 + $0x138] sm:$0xff] %vm177_vm0, %v7698_v0  ;;  %v284_v46 = vmax.f32 %v252_v43, 0.0  ;;  %v285_v49 = vmax.f32 %v253_v47, 0.0  ;;  %v6300_v50 = vld [vmem:[#allocation6 + $0x18] sm:$0xf] }
  0x68   : > { %219 = vst.msk [vmem:[#allocation2 + $0x140] sm:$0xff] %vm177_vm0, %v7698_v0  ;;  %221 = vst.msk [vmem:[#allocation2 + $0x150] sm:$0xff] %vm177_vm0, %v7698_v0  ;;  %v254_v51 = vld [vmem:[%s6128_s3 + $0xa8] sm:$0xff]  ;;  %v255_v52 = vld [vmem:[%s6128_s3 + $0xb0] sm:$0xff]  ;;  %s4295_s27 = sshll.u32 %s7555_s15, 4  ;;  %s4282_s28 = scalar_lea.sflag [#allocation5], %s6122_s19  ;;  %s7620_s27 = int_to_ptr.vmem [resolvable:$true] %s4295_s27 }
  0x69   : > { %222 = vst.msk [vmem:[#allocation2 + $0x158] sm:$0xff] %vm177_vm0, %v7698_v0  ;;  %224 = vst.msk [vmem:[#allocation2 + $0x168] sm:$0xff] %vm177_vm0, %v7698_v0  ;;  %v286_v53 = vmax.f32 %v254_v51, 0.0  ;;  %v287_v54 = vmax.f32 %v255_v52, 0.0  ;;  %v256_v55 = vld [vmem:[%s6128_s3 + $0xb8] sm:$0xff]  ;;  %v257_v56 = vld [vmem:[%s6128_s3 + $0xc0] sm:$0xff] }
  0x6a   : > { %225 = vst.msk [vmem:[#allocation2 + $0x170] sm:$0xff] %vm177_vm0, %v7698_v0  ;;  %227 = vst.msk [vmem:[#allocation2 + $0x180] sm:$0xff] %vm177_vm0, %v7698_v0  ;;  %v258_v57 = vld [vmem:[%s6128_s3 + $0xc8] sm:$0xff]  ;;  %v288_v60 = vmax.f32 %v256_v55, 0.0  ;;  %v289_v61 = vmax.f32 %v257_v56, 0.0  ;;  %v260_v9 = vld [vmem:[%s6128_s3 + $0xd8] sm:$0xff] }
  0x6b   : > { %228 = vst.msk [vmem:[#allocation2 + $0x188] sm:$0xff] %vm177_vm0, %v7698_v0  ;;  %230 = vst.msk [vmem:[#allocation2 + $0x198] sm:$0xff] %vm177_vm0, %v7698_v0  ;;  %v290_v62 = vmax.f32 %v258_v57, 0.0  ;;  %v261_v10 = vld [vmem:[%s6128_s3 + $0xe0] sm:$0xff]  ;;  %v6464_v37 = vld [vmem:[#allocation6 + $0x1c] sm:$0xf] }
  0x6c   : > { %231 = vst.msk [vmem:[#allocation2 + $0x1a0] sm:$0xff] %vm177_vm0, %v7698_v0  ;;  %298 = vst.msk [vmem:[#allocation2 + $0x19] sm:$0xff] %vm177_vm0, %v265_v6  ;;  %v259_v6 = vld [vmem:[%s6128_s3 + $0xd0] sm:$0xff]  ;;  %s5883_s4 = scalar_lea.vmem %s7620_s27, 4096  ;;  %s5965_s5 = smov [#allocation8]  }
  0x6d   : > { %181 = vst.msk [vmem:[#allocation2 + $0x10] sm:$0x3] %vm180_vm1, %v7698_v0  ;;  %184 = vst.msk [vmem:[#allocation2 + $0x28] sm:$0x3] %vm180_vm1, %v7698_v0  ;;  %v291_v8 = vmax.f32 %v259_v6, 0.0  ;;  %v330_v52 = vld [vmem:[#allocation2] sm:$0xff]  ;;  %p5884_p4 = scmp.ne.s32.totalorder %s7620_s27, %s5883_s4 }
  0x6e   : > { %187 = vst.msk [vmem:[#allocation2 + $0x40] sm:$0x3] %vm180_vm1, %v7698_v0  ;;  %190 = vst.msk [vmem:[#allocation2 + $0x58] sm:$0x3] %vm180_vm1, %v7698_v0  ;;  %s5887_s6 = sshll.u32 %s5965_s5, 4  ;;  %s5888_s6 = int_to_ptr.vmem [resolvable:$false] %s5887_s6 }
  0x6f   : > { %193 = vst.msk [vmem:[#allocation2 + $0x70] sm:$0x3] %vm180_vm1, %v7698_v0  ;;  %196 = vst.msk [vmem:[#allocation2 + $0x88] sm:$0x3] %vm180_vm1, %v7698_v0  ;;  %p5885_p6 = pnand %p5884_p4, %p6074_p12  ;;  %s5889_s7 = scalar_lea.vmem %s5888_s6, 8192 }
  0x70   : > { %199 = vst.msk [vmem:[#allocation2 + $0xa0] sm:$0x3] %vm180_vm1, %v7698_v0  ;;  %202 = vst.msk [vmem:[#allocation2 + $0xb8] sm:$0x3] %vm180_vm1, %v7698_v0  ;;  %p5890_p10 = scmp.lt.s32.totalorder %s7620_s27, %s5888_s6  ;;  %p5891_p13 = scmp.lt.s32.totalorder %s5889_s7, %s5883_s4 }
  0x71   : > { %205 = vst.msk [vmem:[#allocation2 + $0xd0] sm:$0x3] %vm180_vm1, %v7698_v0  ;;  %208 = vst.msk [vmem:[#allocation2 + $0xe8] sm:$0x3] %vm180_vm1, %v7698_v0  ;;  %p5886_p8 = pneg %p5885_p6 }
  0x72   : > { %211 = vst.msk [vmem:[#allocation2 + $0x100] sm:$0x3] %vm180_vm1, %v7698_v0  ;;  %214 = vst.msk [vmem:[#allocation2 + $0x118] sm:$0x3] %vm180_vm1, %v7698_v0  ;;  %p5892_p3 = por %p5891_p13, %p5890_p10 }
  0x73   : > { %217 = vst.msk [vmem:[#allocation2 + $0x130] sm:$0x3] %vm180_vm1, %v7698_v0  ;;  %220 = vst.msk [vmem:[#allocation2 + $0x148] sm:$0x3] %vm180_vm1, %v7698_v0  ;;  %v365_v48 = vld [vmem:[#allocation2 + $0x19] sm:$0xff] }
  0x74   : > { %223 = vst.msk [vmem:[#allocation2 + $0x160] sm:$0x3] %vm180_vm1, %v7698_v0  ;;  %226 = vst.msk [vmem:[#allocation2 + $0x178] sm:$0x3] %vm180_vm1, %v7698_v0  ;;  %v364_v5 = vld [vmem:[#allocation2 + $0x9] sm:$0xff]  ;;  %5216 = vmatprep.mubr.msk.f32.mxu0 %vm177_vm0, %v365_v48  ;;  %v6541_v56 = vld [vmem:[#allocation2 + $0x18] sm:$0xff]  ;;  %p5893_p7 = pnand %p5892_p3, %p5886_p8 }
  0x75   : > { %229 = vst.msk [vmem:[#allocation2 + $0x190] sm:$0x3] %vm180_vm1, %v7698_v0  ;;  %232 = vst.msk [vmem:[#allocation2 + $0x1a8] sm:$0x3] %vm180_vm1, %v7698_v0  ;;  %5017 = vmatmul.mubr.msk.f32.vlgmr.msra.gmra.mrb[0].mxu1 %vm177_vm0, %v364_v5 }
  0x76   : > { %299 = vst.msk [vmem:[#allocation2 + $0x21] sm:$0xff] %vm177_vm0, %v266_v11  ;;  %300 = vst.msk [vmem:[#allocation2 + $0x31] sm:$0xff] %vm177_vm0, %v267_v12  ;;  %5065 = vmatpush3.msk.msra.mxu1 %vm493_vm2, %v362_v25  ;;  %5019 = vmatprep.mubr.msk.f32.mxu1 %vm177_vm0, %v365_v48  ;;  %v292_v11 = vmax.f32 %v260_v9, 0.0  ;;  %v293_v12 = vmax.f32 %v261_v10, 0.0  ;;  %v264_v25 = vld [vmem:[%s6128_s3 + $0xf8] sm:$0xff] }
  0x77   : > { %301 = vst.msk [vmem:[#allocation2 + $0x39] sm:$0xff] %vm177_vm0, %v268_v13  ;;  %302 = vst.msk [vmem:[#allocation2 + $0x49] sm:$0xff] %vm177_vm0, %v269_v17  ;;  %v262_v13 = vld [vmem:[%s6128_s3 + $0xe8] sm:$0xff]  ;;  %v296_v27 = vmax.f32 %v264_v25, 0.0 }
  0x78   : > { %303 = vst.msk [vmem:[#allocation2 + $0x51] sm:$0xff] %vm177_vm0, %v270_v18  ;;  %304 = vst.msk [vmem:[#allocation2 + $0x61] sm:$0xff] %vm177_vm0, %v271_v19  ;;  %v294_v14 = vmax.f32 %v262_v13, 0.0  ;;  %v6390_v19 = vld [vmem:[#allocation6 + $0x8] sm:$0xf] }
  0x79   : > { %305 = vst.msk [vmem:[#allocation2 + $0x69] sm:$0xff] %vm177_vm0, %v272_v23  ;;  %306 = vst.msk [vmem:[#allocation2 + $0x79] sm:$0xff] %vm177_vm0, %v273_v24  ;;  %5114 = vmatprep.subr.msk.mxu1 %vm493_vm2, %v6390_v19  ;;  %v263_v24 = vld [vmem:[%s6128_s3 + $0xf0] sm:$0xff] }
  0x7a   : > { %307 = vst.msk [vmem:[#allocation2 + $0x81] sm:$0xff] %vm177_vm0, %v274_v26  ;;  %308 = vst.msk [vmem:[#allocation2 + $0x91] sm:$0xff] %vm177_vm0, %v275_v28  ;;  %v295_v26 = vmax.f32 %v263_v24, 0.0 }
  0x7b   : > { %309 = vst.msk [vmem:[#allocation2 + $0x99] sm:$0xff] %vm177_vm0, %v276_v32  ;;  %310 = vst.msk [vmem:[#allocation2 + $0xa9] sm:$0xff] %vm177_vm0, %v277_v33 }
  0x7c   : > { %311 = vst.msk [vmem:[#allocation2 + $0xb1] sm:$0xff] %vm177_vm0, %v278_v34  ;;  %312 = vst.msk [vmem:[#allocation2 + $0xc1] sm:$0xff] %vm177_vm0, %v279_v38 }
  0x7d   : > { %313 = vst.msk [vmem:[#allocation2 + $0xc9] sm:$0xff] %vm177_vm0, %v280_v39  ;;  %314 = vst.msk [vmem:[#allocation2 + $0xd9] sm:$0xff] %vm177_vm0, %v281_v40  ;;  %v366_v58 = vld [vmem:[#allocation2 + $0x21] sm:$0xff]  ;;  %v6312_v59 = vld [vmem:[#allocation2 + $0x31] sm:$0xff] }
  0x7e   : > { %315 = vst.msk [vmem:[#allocation2 + $0xe1] sm:$0xff] %vm177_vm0, %v282_v44  ;;  %316 = vst.msk [vmem:[#allocation2 + $0xf1] sm:$0xff] %vm177_vm0, %v283_v45  ;;  %5020 = vmatmul.mubr.msk.f32.gmra.mrb[2].mxu1 %vm177_vm0, %v366_v58  ;;  %5217 = vmatmul.mubr.msk.f32.vlgmr.msra.gmra.mrb[0].mxu0 %vm177_vm0, %v366_v58  ;;  %v6323_v63 = vld [vmem:[#allocation2 + $0x39] sm:$0xff]  ;;  %v6330_v1 = vld [vmem:[#allocation2 + $0x49] sm:$0xff] }
  0x7f   : > { %317 = vst.msk [vmem:[#allocation2 + $0xf9] sm:$0xff] %vm177_vm0, %v284_v46  ;;  %318 = vst.msk [vmem:[#allocation2 + $0x109] sm:$0xff] %vm177_vm0, %v285_v49  ;;  %5265 = vmatpush3.msk.msra.mxu0 %vm493_vm2, %v6252_v7  ;;  %5022 = vmatprep.mubr.msk.f32.mxu1 %vm177_vm0, %v6312_v59  ;;  %v6342_v3 = vld [vmem:[#allocation2 + $0x51] sm:$0xff]  ;;  %v6344_v4 = vld [vmem:[#allocation2 + $0x61] sm:$0xff] }
  0x80   : > { %319 = vst.msk [vmem:[#allocation2 + $0x111] sm:$0xff] %vm177_vm0, %v286_v53  ;;  %320 = vst.msk [vmem:[#allocation2 + $0x121] sm:$0xff] %vm177_vm0, %v287_v54  ;;  %5219 = vmatprep.mubr.msk.f32.mxu0 %vm177_vm0, %v6312_v59  ;;  %5314 = vmatprep.subr.msk.mxu0 %vm493_vm2, %v6300_v50  ;;  %v6354_v5 = vld [vmem:[#allocation2 + $0x69] sm:$0xff]  ;;  %v6357_v7 = vld [vmem:[#allocation2 + $0x79] sm:$0xff] }
  0x81   : > { %321 = vst.msk [vmem:[#allocation2 + $0x129] sm:$0xff] %vm177_vm0, %v288_v60  ;;  %322 = vst.msk [vmem:[#allocation2 + $0x139] sm:$0xff] %vm177_vm0, %v289_v61  ;;  %v6371_v15 = vld [vmem:[#allocation2 + $0x81] sm:$0xff]  ;;  %v6375_v16 = vld [vmem:[#allocation2 + $0x91] sm:$0xff] }
  0x82   : > { %323 = vst.msk [vmem:[#allocation2 + $0x141] sm:$0xff] %vm177_vm0, %v290_v62  ;;  %5023 = vmatmul.mubr.msk.f32.gmra.mrb[4].mxu1 %vm177_vm0, %v6323_v63  ;;  %5220 = vmatmul.mubr.msk.f32.gmra.mrb[2].mxu0 %vm177_vm0, %v6323_v63  ;;  %324 = vst.msk [vmem:[#allocation2 + $0x151] sm:$0xff] %vm177_vm0, %v291_v8  ;;  %v6386_v17 = vld [vmem:[#allocation2 + $0x99] sm:$0xff]  ;;  %v6388_v18 = vld [vmem:[#allocation2 + $0xa9] sm:$0xff] }
  0x83   : > { %5025 = vmatprep.mubr.msk.f32.mxu1 %vm177_vm0, %v6330_v1  ;;  %5222 = vmatprep.mubr.msk.f32.mxu0 %vm177_vm0, %v6330_v1  ;;  %325 = vst.msk [vmem:[#allocation2 + $0x159] sm:$0xff] %vm177_vm0, %v292_v11  ;;  %326 = vst.msk [vmem:[#allocation2 + $0x169] sm:$0xff] %vm177_vm0, %v293_v12  ;;  %v6400_v20 = vld [vmem:[#allocation2 + $0xb1] sm:$0xff]  ;;  %v6402_v21 = vld [vmem:[#allocation2 + $0xc1] sm:$0xff] }
  0x84   : > { %327 = vst.msk [vmem:[#allocation2 + $0x171] sm:$0xff] %vm177_vm0, %v294_v14  ;;  %7753 = vst [vmem:[#allocation12_spill] sm:$0xff] %v6386_v17  ;;  %v6414_v22 = vld [vmem:[#allocation2 + $0xc9] sm:$0xff]  ;;  %v6416_v23 = vld [vmem:[#allocation2 + $0xd9] sm:$0xff] }
  0x85   : > { %7754 = vst [vmem:[#allocation13_spill] sm:$0xff] %v6388_v18  ;;  %7755 = vst [vmem:[#allocation14_spill] sm:$0xff] %v6400_v20  ;;  %v6428_v28 = vld [vmem:[#allocation2 + $0xe1] sm:$0xff]  ;;  %v6430_v29 = vld [vmem:[#allocation2 + $0xf1] sm:$0xff] }
  0x86   : > { %5026 = vmatmul.mubr.msk.f32.gmra.mrb[6].mxu1 %vm177_vm0, %v6342_v3  ;;  %5223 = vmatmul.mubr.msk.f32.gmra.mrb[4].mxu0 %vm177_vm0, %v6342_v3  ;;  %7756 = vst [vmem:[#allocation15_spill] sm:$0xff] %v6402_v21  ;;  %7757 = vst [vmem:[#allocation16_spill] sm:$0xff] %v6414_v22  ;;  %v6442_v30 = vld [vmem:[#allocation2 + $0xf9] sm:$0xff]  ;;  %v6444_v31 = vld [vmem:[#allocation2 + $0x109] sm:$0xff] }
  0x87   : > { %5028 = vmatprep.mubr.msk.f32.mxu1 %vm177_vm0, %v6344_v4  ;;  %5225 = vmatprep.mubr.msk.f32.mxu0 %vm177_vm0, %v6344_v4  ;;  %7758 = vst [vmem:[#allocation17_spill] sm:$0xff] %v6416_v23  ;;  %7759 = vst [vmem:[#allocation18_spill] sm:$0xff] %v6428_v28  ;;  %v6446_v32 = vld [vmem:[#allocation2 + $0x1a] sm:$0xff]  ;;  %v6456_v33 = vld [vmem:[#allocation2 + $0x111] sm:$0xff] }
  0x88   : > { %7760 = vst [vmem:[#allocation19_spill] sm:$0xff] %v6430_v29  ;;  %328 = vst.msk [vmem:[#allocation2 + $0x181] sm:$0xff] %vm177_vm0, %v295_v26  ;;  %v6458_v34 = vld [vmem:[#allocation2 + $0x22] sm:$0xff]  ;;  %v6462_v36 = vld [vmem:[#allocation2 + $0x32] sm:$0xff] }
  0x89   : > { %329 = vst.msk [vmem:[#allocation2 + $0x189] sm:$0xff] %vm177_vm0, %v296_v27  ;;  %7761 = vst [vmem:[#allocation20_spill] sm:$0xff] %v6442_v30  ;;  %v6460_v35 = vld [vmem:[#allocation2 + $0x121] sm:$0xff]  ;;  %v6474_v38 = vld [vmem:[#allocation2 + $0x129] sm:$0xff] }
  0x8a   : > { %5029 = vmatmul.mubr.msk.f32.gmra.mrb[8].mxu1 %vm177_vm0, %v6354_v5  ;;  %5226 = vmatmul.mubr.msk.f32.gmra.mrb[6].mxu0 %vm177_vm0, %v6354_v5  ;;  %7762 = vst [vmem:[#allocation21_spill] sm:$0xff] %v6444_v31  ;;  %7763 = vst [vmem:[#allocation22_spill] sm:$0xff] %v6456_v33  ;;  %v6476_v39 = vld [vmem:[#allocation2 + $0x3a] sm:$0xff]  ;;  %v6482_v41 = vld [vmem:[#allocation2 + $0x4a] sm:$0xff] }
  0x8b   : > { %5031 = vmatprep.mubr.msk.f32.mxu1 %vm177_vm0, %v6357_v7  ;;  %5228 = vmatprep.mubr.msk.f32.mxu0 %vm177_vm0, %v6357_v7  ;;  %7764 = vst [vmem:[#allocation23_spill] sm:$0xff] %v6460_v35  ;;  %7765 = vst [vmem:[#allocation24_spill] sm:$0xff] %v6474_v38  ;;  %v6480_v40 = vld [vmem:[#allocation2 + $0x139] sm:$0xff]  ;;  %v6494_v42 = vld [vmem:[#allocation2 + $0x141] sm:$0xff] }
  0x8c   : > { %7766 = vst [vmem:[#allocation25_spill] sm:$0xff] %v6480_v40  ;;  %7767 = vst [vmem:[#allocation26_spill] sm:$0xff] %v6494_v42  ;;  %v6496_v43 = vld [vmem:[#allocation2 + $0x52] sm:$0xff]  ;;  %v6500_v45 = vld [vmem:[#allocation2 + $0x62] sm:$0xff] }
  0x8d   : > { %v6498_v44 = vld [vmem:[#allocation2 + $0x151] sm:$0xff]  ;;  %v6510_v46 = vld [vmem:[#allocation2 + $0x159] sm:$0xff]  ;;  %v6514_v48 = vld [vmem:[#allocation2 + $0x169] sm:$0xff]  ;;  %7772 = vst [vmem:[#allocation31_spill] sm:$0xff] %v6541_v56 }
  0x8e   : > { %5032 = vmatmul.mubr.msk.f32.gmra.mrb[10].mxu1 %vm177_vm0, %v6371_v15  ;;  %5229 = vmatmul.mubr.msk.f32.gmra.mrb[8].mxu0 %vm177_vm0, %v6371_v15  ;;  %7768 = vst [vmem:[#allocation27_spill] sm:$0xff] %v6498_v44  ;;  %7769 = vst [vmem:[#allocation28_spill] sm:$0xff] %v6510_v46  ;;  %v6512_v47 = vld [vmem:[#allocation2 + $0x6a] sm:$0xff]  ;;  %v6516_v49 = vld [vmem:[#allocation2 + $0x7a] sm:$0xff] }
  0x8f   : > { %5034 = vmatprep.mubr.msk.f32.mxu1 %vm177_vm0, %v6375_v16  ;;  %5231 = vmatprep.mubr.msk.f32.mxu0 %vm177_vm0, %v6375_v16  ;;  %7770 = vst [vmem:[#allocation29_spill] sm:$0xff] %v6514_v48  ;;  %v6528_v51 = vld [vmem:[#allocation2 + $0x82] sm:$0xff]  ;;  %v6530_v53 = vld [vmem:[#allocation2 + $0x92] sm:$0xff]  ;;  %v6539_v55 = vld [vmem:[#allocation2 + $0x9a] sm:$0xff] }
  0x90   : > { %v331_v54 = vld [vmem:[#allocation2 + $0x8] sm:$0xff]  ;;  %v6548_v58 = vld [vmem:[#allocation6 + $0xc] sm:$0xf]  ;;  %v6554_v60 = vld [vmem:[#allocation2 + $0x20] sm:$0xff] }
  0x91   : > { %v6543_v57 = vld [vmem:[#allocation2 + $0xaa] sm:$0xff]  ;;  %7773 = vst [vmem:[#allocation32_spill] sm:$0xff] %v6554_v60  ;;  %v6556_v61 = vld [vmem:[#allocation2 + $0xb2] sm:$0xff]  ;;  %v6560_v6 = vld [vmem:[#allocation2 + $0xc2] sm:$0xff] }
  0x92   : > { %5035 = vmatmul.mubr.msk.f32.gmra.mrb[12].mxu1 %vm177_vm0, %v6386_v17  ;;  %5232 = vmatmul.mubr.msk.f32.gmra.mrb[10].mxu0 %vm177_vm0, %v6386_v17  ;;  %v6558_v62 = vld [vmem:[#allocation2 + $0x30] sm:$0xff]  ;;  %v6574_v8 = vld [vmem:[#allocation2 + $0x38] sm:$0xff]  ;;  %v6578_v10 = vld [vmem:[#allocation2 + $0x48] sm:$0xff] }
  0x93   : > { %5037 = vmatprep.mubr.msk.f32.mxu1 %vm177_vm0, %v6388_v18  ;;  %5234 = vmatprep.mubr.msk.f32.mxu0 %vm177_vm0, %v6388_v18  ;;  %7774 = vst [vmem:[#allocation33_spill] sm:$0xff] %v6558_v62  ;;  %7775 = vst [vmem:[#allocation34_spill] sm:$0xff] %v6574_v8  ;;  %v6576_v9 = vld [vmem:[#allocation2 + $0xca] sm:$0xff]  ;;  %v6580_v11 = vld [vmem:[#allocation2 + $0xda] sm:$0xff] }
  0x94   : > { %7776 = vst [vmem:[#allocation35_spill] sm:$0xff] %v6578_v10  ;;  %v6590_v12 = vld [vmem:[#allocation2 + $0x50] sm:$0xff]  ;;  %v6592_v13 = vld [vmem:[#allocation2 + $0xe2] sm:$0xff]  ;;  %v6608_v25 = vld [vmem:[#allocation2 + $0xfa] sm:$0xff] }
  0x95   : > { %7777 = vst [vmem:[#allocation36_spill] sm:$0xff] %v6590_v12  ;;  %v6594_v14 = vld [vmem:[#allocation2 + $0x60] sm:$0xff]  ;;  %v6606_v24 = vld [vmem:[#allocation2 + $0x68] sm:$0xff]  ;;  %v6610_v26 = vld [vmem:[#allocation2 + $0x78] sm:$0xff] }
  0x96   : > { %5038 = vmatmul.mubr.msk.f32.gmra.mrb[14].mxu1 %vm177_vm0, %v6400_v20  ;;  %5235 = vmatmul.mubr.msk.f32.gmra.mrb[12].mxu0 %vm177_vm0, %v6400_v20  ;;  %7778 = vst [vmem:[#allocation37_spill] sm:$0xff] %v6594_v14  ;;  %7779 = vst [vmem:[#allocation38_spill] sm:$0xff] %v6606_v24  ;;  %v6612_v27 = vld [vmem:[#allocation2 + $0x10a] sm:$0xff]  ;;  %v6692_v20 = vld [vmem:[#allocation2 + $0x182] sm:$0xff] }
  0x97   : > { %5040 = vmatprep.mubr.msk.f32.mxu1 %vm177_vm0, %v6402_v21  ;;  %5237 = vmatprep.mubr.msk.f32.mxu0 %vm177_vm0, %v6402_v21  ;;  %v6626_v0 = vld [vmem:[#allocation2 + $0x90] sm:$0xff]  ;;  %7782 = vst [vmem:[#allocation41_spill] sm:$0xff] %v6692_v20 }
  0x98   : > { %v6690_v21 = vld [vmem:[#allocation2 + $0xf0] sm:$0xff] }
  0x99   : > { %v6704_v18 = vld [vmem:[#allocation2 + $0x18a] sm:$0xff] }
  0x9a   : > { %5041 = vmatmul.mubr.msk.f32.gmra.mrb[16].mxu1 %vm177_vm0, %v6414_v22  ;;  %5238 = vmatmul.mubr.msk.f32.gmra.mrb[14].mxu0 %vm177_vm0, %v6414_v22  ;;  %v6688_v22 = vld [vmem:[#allocation2 + $0x172] sm:$0xff]  ;;  %7783 = vst [vmem:[#allocation42_spill] sm:$0xff] %v6704_v18 }
  0x9b   : > { %5043 = vmatprep.mubr.msk.f32.mxu1 %vm177_vm0, %v6416_v23  ;;  %5240 = vmatprep.mubr.msk.f32.mxu0 %vm177_vm0, %v6416_v23  ;;  %v6686_v23 = vld [vmem:[#allocation2 + $0xe0] sm:$0xff]  ;;  %7781 = vst [vmem:[#allocation40_spill] sm:$0xff] %v6688_v22  ;;  %v6716_v17 = vld [vmem:[#allocation2 + $0x110] sm:$0xff] }
  0x9e   : > { %5044 = vmatmul.mubr.msk.f32.gmra.mrb[18].mxu1 %vm177_vm0, %v6428_v28  ;;  %5241 = vmatmul.mubr.msk.f32.gmra.mrb[16].mxu0 %vm177_vm0, %v6428_v28  ;;  %v6676_v28 = vld [vmem:[#allocation2 + $0x16a] sm:$0xff] }
  0x9f   : > { %5046 = vmatprep.mubr.msk.f32.mxu1 %vm177_vm0, %v6430_v29  ;;  %5243 = vmatprep.mubr.msk.f32.mxu0 %vm177_vm0, %v6430_v29  ;;  %v6674_v29 = vld [vmem:[#allocation2 + $0xd8] sm:$0xff] }
  0xa2   : > { %5047 = vmatmul.mubr.msk.f32.gmra.mrb[20].mxu1 %vm177_vm0, %v6442_v30  ;;  %5244 = vmatmul.mubr.msk.f32.gmra.mrb[18].mxu0 %vm177_vm0, %v6442_v30  ;;  %v6672_v30 = vld [vmem:[#allocation2 + $0x15a] sm:$0xff] }
  0xa3   : > { %5049 = vmatprep.mubr.msk.f32.mxu1 %vm177_vm0, %v6444_v31  ;;  %5266 = vmatprep.mubr.msk.f32.mxu0 %vm177_vm0, %v6446_v32  ;;  %v6670_v31 = vld [vmem:[#allocation2 + $0xc8] sm:$0xff] }
  0xa6   : > { %5050 = vmatmul.mubr.msk.f32.gmra.mrb[22].mxu1 %vm177_vm0, %v6456_v33  ;;  %5267 = vmatmul.mubr.msk.f32.vlgmr.msra.gmra.mrb[0].mxu0 %vm177_vm0, %v6458_v34  ;;  %v6660_v33 = vld [vmem:[#allocation2 + $0x152] sm:$0xff] }
  0xa7   : > { %5315 = vmatpush3.msk.msra.mxu0 %vm493_vm2, %v6300_v50  ;;  %5052 = vmatprep.mubr.msk.f32.mxu1 %vm177_vm0, %v6460_v35  ;;  %v6526_v50 = vld [vmem:[#allocation2 + $0x171] sm:$0xff]  ;;  %v6658_v35 = vld [vmem:[#allocation2 + $0xc0] sm:$0xff] }
  0xa8   : > { %5269 = vmatprep.mubr.msk.f32.mxu0 %vm177_vm0, %v6462_v36  ;;  %5364 = vmatprep.subr.msk.mxu0 %vm493_vm2, %v6464_v37  ;;  %7771 = vst [vmem:[#allocation30_spill] sm:$0xff] %v6526_v50 }
  0xaa   : > { %5053 = vmatmul.mubr.msk.f32.gmra.mrb[24].mxu1 %vm177_vm0, %v6474_v38  ;;  %5270 = vmatmul.mubr.msk.f32.gmra.mrb[2].mxu0 %vm177_vm0, %v6476_v39  ;;  %v6656_v38 = vld [vmem:[#allocation2 + $0x142] sm:$0xff] }
  0xab   : > { %5055 = vmatprep.mubr.msk.f32.mxu1 %vm177_vm0, %v6480_v40  ;;  %5272 = vmatprep.mubr.msk.f32.mxu0 %vm177_vm0, %v6482_v41  ;;  %v6654_v40 = vld [vmem:[#allocation2 + $0xb0] sm:$0xff] }
  0xae   : > { %5056 = vmatmul.mubr.msk.f32.gmra.mrb[26].mxu1 %vm177_vm0, %v6494_v42  ;;  %5273 = vmatmul.mubr.msk.f32.gmra.mrb[4].mxu0 %vm177_vm0, %v6496_v43  ;;  %v6644_v42 = vld [vmem:[#allocation2 + $0x13a] sm:$0xff] }
  0xaf   : > { %5058 = vmatprep.mubr.msk.f32.mxu1 %vm177_vm0, %v6498_v44  ;;  %5275 = vmatprep.mubr.msk.f32.mxu0 %vm177_vm0, %v6500_v45  ;;  %v6642_v44 = vld [vmem:[#allocation2 + $0xa8] sm:$0xff] }
  0xb2   : > { %5059 = vmatmul.mubr.msk.f32.gmra.mrb[28].mxu1 %vm177_vm0, %v6510_v46  ;;  %5276 = vmatmul.mubr.msk.f32.gmra.mrb[6].mxu0 %vm177_vm0, %v6512_v47  ;;  %v6640_v46 = vld [vmem:[#allocation2 + $0x12a] sm:$0xff] }
  0xb3   : > { %5061 = vmatprep.mubr.msk.f32.mxu1 %vm177_vm0, %v6514_v48  ;;  %5278 = vmatprep.mubr.msk.f32.mxu0 %vm177_vm0, %v6516_v49  ;;  %v6638_v48 = vld [vmem:[#allocation2 + $0x98] sm:$0xff] }
  0xb6   : > { %5062 = vmatmul.mubr.msk.f32.gmra.mrb[30].mxu1 %vm177_vm0, %v6526_v50  ;;  %5279 = vmatmul.mubr.msk.f32.gmra.mrb[8].mxu0 %vm177_vm0, %v6528_v51  ;;  %v6628_v50 = vld [vmem:[#allocation2 + $0x122] sm:$0xff] }
  0xb7   : > { %5066 = vmatprep.mubr.msk.f32.mxu1 %vm177_vm0, %v330_v52  ;;  %5281 = vmatprep.mubr.msk.f32.mxu0 %vm177_vm0, %v6530_v53  ;;  %v6622_v52 = vld [vmem:[#allocation2 + $0x80] sm:$0xff] }
  0xb8   : > { %7780 = vst [vmem:[#allocation39_spill] sm:$0xff] %v6622_v52 }
  0xba   : > { %5067 = vmatmul.mubr.msk.f32.vlgmr.msra.gmra.mrb[0].mxu1 %vm177_vm0, %v331_v54  ;;  %5282 = vmatmul.mubr.msk.f32.gmra.mrb[10].mxu0 %vm177_vm0, %v6539_v55  ;;  %v6624_v54 = vld [vmem:[#allocation2 + $0x112] sm:$0xff] }
  0xbb   : > { %5069 = vmatprep.mubr.msk.f32.mxu1 %vm177_vm0, %v6541_v56  ;;  %5284 = vmatprep.mubr.msk.f32.mxu0 %vm177_vm0, %v6543_v57  ;;  %v6706_v56 = vld [vmem:[#allocation2 + $0x108] sm:$0xff] }
  0xbc   : > { %5115 = vmatpush3.msk.msra.mxu1 %vm493_vm2, %v6390_v19  ;;  %v6596_v19 = vld [vmem:[#allocation2 + $0xf2] sm:$0xff] }
  0xbd   : > { %5164 = vmatprep.subr.msk.mxu1 %vm493_vm2, %v6548_v58 }
  0xbe   : > { %5070 = vmatmul.mubr.msk.f32.gmra.mrb[2].mxu1 %vm177_vm0, %v6554_v60  ;;  %5285 = vmatmul.mubr.msk.f32.gmra.mrb[12].mxu0 %vm177_vm0, %v6556_v61  ;;  %v6702_v60 = vld [vmem:[#allocation2 + $0xf8] sm:$0xff] }
  0xbf   : > { %5072 = vmatprep.mubr.msk.f32.mxu1 %vm177_vm0, %v6558_v62  ;;  %5287 = vmatprep.mubr.msk.f32.mxu0 %vm177_vm0, %v6560_v6 }
  0xc2   : > { %5073 = vmatmul.mubr.msk.f32.gmra.mrb[4].mxu1 %vm177_vm0, %v6574_v8  ;;  %5288 = vmatmul.mubr.msk.f32.gmra.mrb[14].mxu0 %vm177_vm0, %v6576_v9 }
  0xc3   : > { %5075 = vmatprep.mubr.msk.f32.mxu1 %vm177_vm0, %v6578_v10  ;;  %5290 = vmatprep.mubr.msk.f32.mxu0 %vm177_vm0, %v6580_v11 }
  0xc6   : > { %5076 = vmatmul.mubr.msk.f32.gmra.mrb[6].mxu1 %vm177_vm0, %v6590_v12  ;;  %5291 = vmatmul.mubr.msk.f32.gmra.mrb[16].mxu0 %vm177_vm0, %v6592_v13 }
  0xc7   : > { %5078 = vmatprep.mubr.msk.f32.mxu1 %vm177_vm0, %v6594_v14  ;;  %5293 = vmatprep.mubr.msk.f32.mxu0 %vm177_vm0, %v6596_v19 }
  0xca   : > { %5079 = vmatmul.mubr.msk.f32.gmra.mrb[8].mxu1 %vm177_vm0, %v6606_v24  ;;  %5294 = vmatmul.mubr.msk.f32.gmra.mrb[18].mxu0 %vm177_vm0, %v6608_v25 }
  0xcb   : > { %5081 = vmatprep.mubr.msk.f32.mxu1 %vm177_vm0, %v6610_v26  ;;  %5296 = vmatprep.mubr.msk.f32.mxu0 %vm177_vm0, %v6612_v27 }
  0xce   : > { %5082 = vmatmul.mubr.msk.f32.gmra.mrb[10].mxu1 %vm177_vm0, %v6622_v52  ;;  %5297 = vmatmul.mubr.msk.f32.gmra.mrb[20].mxu0 %vm177_vm0, %v6624_v54 }
  0xcf   : > { %5084 = vmatprep.mubr.msk.f32.mxu1 %vm177_vm0, %v6626_v0  ;;  %5299 = vmatprep.mubr.msk.f32.mxu0 %vm177_vm0, %v6628_v50 }
  0xd2   : > { %5085 = vmatmul.mubr.msk.f32.gmra.mrb[12].mxu1 %vm177_vm0, %v6638_v48  ;;  %5300 = vmatmul.mubr.msk.f32.gmra.mrb[22].mxu0 %vm177_vm0, %v6640_v46 }
  0xd3   : > { %5087 = vmatprep.mubr.msk.f32.mxu1 %vm177_vm0, %v6642_v44  ;;  %5302 = vmatprep.mubr.msk.f32.mxu0 %vm177_vm0, %v6644_v42 }
  0xd6   : > { %5088 = vmatmul.mubr.msk.f32.gmra.mrb[14].mxu1 %vm177_vm0, %v6654_v40  ;;  %5303 = vmatmul.mubr.msk.f32.gmra.mrb[24].mxu0 %vm177_vm0, %v6656_v38 }
  0xd7   : > { %5090 = vmatprep.mubr.msk.f32.mxu1 %vm177_vm0, %v6658_v35  ;;  %5305 = vmatprep.mubr.msk.f32.mxu0 %vm177_vm0, %v6660_v33 }
  0xda   : > { %5091 = vmatmul.mubr.msk.f32.gmra.mrb[16].mxu1 %vm177_vm0, %v6670_v31  ;;  %5306 = vmatmul.mubr.msk.f32.gmra.mrb[26].mxu0 %vm177_vm0, %v6672_v30 }
  0xdb   : > { %5093 = vmatprep.mubr.msk.f32.mxu1 %vm177_vm0, %v6674_v29  ;;  %5308 = vmatprep.mubr.msk.f32.mxu0 %vm177_vm0, %v6676_v28 }
  0xde   : > { %5094 = vmatmul.mubr.msk.f32.gmra.mrb[18].mxu1 %vm177_vm0, %v6686_v23  ;;  %5309 = vmatmul.mubr.msk.f32.gmra.mrb[28].mxu0 %vm177_vm0, %v6688_v22  ;;  %v6720_v22 = vld [vmem:[#allocation6 + $0x20] sm:$0xf] }
  0xdf   : > { %5096 = vmatprep.mubr.msk.f32.mxu1 %vm177_vm0, %v6690_v21  ;;  %5311 = vmatprep.mubr.msk.f32.mxu0 %vm177_vm0, %v6692_v20  ;;  %v6718_v20 = vld [vmem:[#allocation2 + $0x120] sm:$0xff] }
  0xe2   : > { %5097 = vmatmul.mubr.msk.f32.gmra.mrb[20].mxu1 %vm177_vm0, %v6702_v60  ;;  %5312 = vmatmul.mubr.msk.f32.gmra.mrb[30].mxu0 %vm177_vm0, %v6704_v18  ;;  %v6730_v18 = vld [vmem:[#allocation2 + $0x128] sm:$0xff] }
  0xe3   : > { %5099 = vmatprep.mubr.msk.f32.mxu1 %vm177_vm0, %v6706_v56  ;;  %5316 = vmatprep.mubr.msk.f32.mxu0 %vm177_vm0, %v6558_v62  ;;  %v6734_v62 = vld [vmem:[#allocation2 + $0x138] sm:$0xff] }
  0xe6   : > { %5100 = vmatmul.mubr.msk.f32.gmra.mrb[22].mxu1 %vm177_vm0, %v6716_v17  ;;  %5317 = vmatmul.mubr.msk.f32.vlgmr.msra.gmra.mrb[0].mxu0 %vm177_vm0, %v6574_v8  ;;  %v6760_v8 = vld [vmem:[#allocation2 + $0x168] sm:$0xff] }
  0xe7   : > { %5365 = vmatpush3.msk.msra.mxu0 %vm493_vm2, %v6464_v37  ;;  %5102 = vmatprep.mubr.msk.f32.mxu1 %vm177_vm0, %v6718_v20  ;;  %v6746_v37 = vld [vmem:[#allocation2 + $0x140] sm:$0xff] }
  0xe8   : > { %5319 = vmatprep.mubr.msk.f32.mxu0 %vm177_vm0, %v6578_v10  ;;  %5414 = vmatprep.subr.msk.mxu0 %vm493_vm2, %v6720_v22  ;;  %v6748_v10 = vld [vmem:[#allocation2 + $0x150] sm:$0xff] }
  0xea   : > { %5103 = vmatmul.mubr.msk.f32.gmra.mrb[24].mxu1 %vm177_vm0, %v6730_v18  ;;  %5320 = vmatmul.mubr.msk.f32.gmra.mrb[2].mxu0 %vm177_vm0, %v6590_v12  ;;  %v6758_v12 = vld [vmem:[#allocation2 + $0x158] sm:$0xff] }
  0xeb   : > { %5105 = vmatprep.mubr.msk.f32.mxu1 %vm177_vm0, %v6734_v62  ;;  %5322 = vmatprep.mubr.msk.f32.mxu0 %vm177_vm0, %v6594_v14  ;;  %v1046_v14 = vld [vmem:[#allocation2 + $0x2] sm:$0xff] }
  0xee   : > { %5106 = vmatmul.mubr.msk.f32.gmra.mrb[26].mxu1 %vm177_vm0, %v6746_v37  ;;  %5323 = vmatmul.mubr.msk.f32.gmra.mrb[4].mxu0 %vm177_vm0, %v6606_v24  ;;  %v6770_v24 = vld [vmem:[#allocation2 + $0x170] sm:$0xff] }
  0xef   : > { %5108 = vmatprep.mubr.msk.f32.mxu1 %vm177_vm0, %v6748_v10  ;;  %5325 = vmatprep.mubr.msk.f32.mxu0 %vm177_vm0, %v6610_v26 }
  0xf2   : > { %5109 = vmatmul.mubr.msk.f32.gmra.mrb[28].mxu1 %vm177_vm0, %v6758_v12  ;;  %5326 = vmatmul.mubr.msk.f32.gmra.mrb[6].mxu0 %vm177_vm0, %v6622_v52  ;;  %v1047_v52 = vld [vmem:[#allocation2 + $0xa] sm:$0xff] }
  0xf3   : > { %5111 = vmatprep.mubr.msk.f32.mxu1 %vm177_vm0, %v6760_v8  ;;  %5328 = vmatprep.mubr.msk.f32.mxu0 %vm177_vm0, %v6626_v0 }
  0xf6   : > { %5112 = vmatmul.mubr.msk.f32.gmra.mrb[30].mxu1 %vm177_vm0, %v6770_v24  ;;  %5329 = vmatmul.mubr.msk.f32.gmra.mrb[8].mxu0 %vm177_vm0, %v6638_v48 }
  0xf7   : > { %5116 = vmatprep.mubr.msk.f32.mxu1 %vm177_vm0, %v1046_v14  ;;  %5331 = vmatprep.mubr.msk.f32.mxu0 %vm177_vm0, %v6642_v44  ;;  %v2638_v14 = vld [vmem:[#allocation2 + $0x1a0] sm:$0xff] }
  0xfa   : > { %5117 = vmatmul.mubr.msk.f32.vlgmr.msra.gmra.mrb[0].mxu1 %vm177_vm0, %v1047_v52  ;;  %5332 = vmatmul.mubr.msk.f32.gmra.mrb[10].mxu0 %vm177_vm0, %v6654_v40  ;;  %v7794_v52 = vld [vmem:[#allocation35_spill] sm:$0xff] }
  0xfb   : > { %5119 = vmatprep.mubr.msk.f32.mxu1 %vm177_vm0, %v6446_v32  ;;  %5334 = vmatprep.mubr.msk.f32.mxu0 %vm177_vm0, %v6658_v35  ;;  %v6846_v32 = vld [vmem:[#allocation2 + $0x180] sm:$0xff] }
  0xfc   : > { %5165 = vmatpush3.msk.msra.mxu1 %vm493_vm2, %v6548_v58  ;;  %v2637_v58 = vld [vmem:[#allocation2 + $0x198] sm:$0xff] }
  0xfd   : > { %5498 = vmatprep.subr.msk.mxu1 %vm493_vm2, %v6246_v2 }
  0xfe   : > { %5120 = vmatmul.mubr.msk.f32.gmra.mrb[2].mxu1 %vm177_vm0, %v6458_v34  ;;  %5335 = vmatmul.mubr.msk.f32.gmra.mrb[12].mxu0 %vm177_vm0, %v6670_v31  ;;  %v6856_v34 = vld [vmem:[#allocation2 + $0x188] sm:$0xff] }
  0xff   : > { %5122 = vmatprep.mubr.msk.f32.mxu1 %vm177_vm0, %v6462_v36  ;;  %5337 = vmatprep.mubr.msk.f32.mxu0 %vm177_vm0, %v6674_v29 }
 0x102   : > { %5123 = vmatmul.mubr.msk.f32.gmra.mrb[4].mxu1 %vm177_vm0, %v6476_v39  ;;  %5338 = vmatmul.mubr.msk.f32.gmra.mrb[14].mxu0 %vm177_vm0, %v6686_v23 }
 0x103   : > { %5125 = vmatprep.mubr.msk.f32.mxu1 %vm177_vm0, %v6482_v41  ;;  %5340 = vmatprep.mubr.msk.f32.mxu0 %vm177_vm0, %v6690_v21 }
 0x106   : > { %5126 = vmatmul.mubr.msk.f32.gmra.mrb[6].mxu1 %vm177_vm0, %v6496_v43  ;;  %5341 = vmatmul.mubr.msk.f32.gmra.mrb[16].mxu0 %vm177_vm0, %v6702_v60 }
 0x107   : > { %5128 = vmatprep.mubr.msk.f32.mxu1 %vm177_vm0, %v6500_v45  ;;  %5343 = vmatprep.mubr.msk.f32.mxu0 %vm177_vm0, %v6706_v56 }
 0x10a   : > { %5129 = vmatmul.mubr.msk.f32.gmra.mrb[8].mxu1 %vm177_vm0, %v6512_v47  ;;  %5344 = vmatmul.mubr.msk.f32.gmra.mrb[18].mxu0 %vm177_vm0, %v6716_v17 }
 0x10b   : > { %5131 = vmatprep.mubr.msk.f32.mxu1 %vm177_vm0, %v6516_v49  ;;  %5346 = vmatprep.mubr.msk.f32.mxu0 %vm177_vm0, %v6718_v20 }
 0x10e   : > { %5132 = vmatmul.mubr.msk.f32.gmra.mrb[10].mxu1 %vm177_vm0, %v6528_v51  ;;  %5347 = vmatmul.mubr.msk.f32.gmra.mrb[20].mxu0 %vm177_vm0, %v6730_v18 }
 0x10f   : > { %5134 = vmatprep.mubr.msk.f32.mxu1 %vm177_vm0, %v6530_v53  ;;  %5349 = vmatprep.mubr.msk.f32.mxu0 %vm177_vm0, %v6734_v62 }
 0x112   : > { %5135 = vmatmul.mubr.msk.f32.gmra.mrb[12].mxu1 %vm177_vm0, %v6539_v55  ;;  %5350 = vmatmul.mubr.msk.f32.gmra.mrb[22].mxu0 %vm177_vm0, %v6746_v37 }
 0x113   : > { %5137 = vmatprep.mubr.msk.f32.mxu1 %vm177_vm0, %v6543_v57  ;;  %5352 = vmatprep.mubr.msk.f32.mxu0 %vm177_vm0, %v6748_v10 }
 0x116   : > { %5138 = vmatmul.mubr.msk.f32.gmra.mrb[14].mxu1 %vm177_vm0, %v6556_v61  ;;  %5353 = vmatmul.mubr.msk.f32.gmra.mrb[24].mxu0 %vm177_vm0, %v6758_v12 }
 0x117   : > { %5140 = vmatprep.mubr.msk.f32.mxu1 %vm177_vm0, %v6560_v6  ;;  %5355 = vmatprep.mubr.msk.f32.mxu0 %vm177_vm0, %v6760_v8 }
 0x11a   : > { %5141 = vmatmul.mubr.msk.f32.gmra.mrb[16].mxu1 %vm177_vm0, %v6576_v9  ;;  %5356 = vmatmul.mubr.msk.f32.gmra.mrb[26].mxu0 %vm177_vm0, %v6770_v24 }
 0x11b   : > { %5143 = vmatprep.mubr.msk.f32.mxu1 %vm177_vm0, %v6580_v11  ;;  %5358 = vmatprep.mubr.msk.f32.mxu0 %vm177_vm0, %v6846_v32 }
 0x11e   : > { %5144 = vmatmul.mubr.msk.f32.gmra.mrb[18].mxu1 %vm177_vm0, %v6592_v13  ;;  %5359 = vmatmul.mubr.msk.f32.gmra.mrb[28].mxu0 %vm177_vm0, %v6856_v34 }
 0x11f   : > { %5146 = vmatprep.mubr.msk.f32.mxu1 %vm177_vm0, %v6596_v19  ;;  %5361 = vmatprep.mubr.msk.f32.mxu0 %vm177_vm0, %v2637_v58  ;;  %v7795_v58 = vld [vmem:[#allocation17_spill] sm:$0xff] }
 0x122   : > { %5147 = vmatmul.mubr.msk.f32.gmra.mrb[20].mxu1 %vm177_vm0, %v6608_v25  ;;  %5362 = vmatmul.mubr.msk.f32.gmra.mrb[30].mxu0 %vm177_vm0, %v2638_v14  ;;  %v7796_v14 = vld [vmem:[#allocation36_spill] sm:$0xff] }
 0x123   : > { %5149 = vmatprep.mubr.msk.f32.mxu1 %vm177_vm0, %v6612_v27  ;;  %5366 = vmatprep.mubr.msk.f32.mxu0 %vm177_vm0, %v6312_v59  ;;  %v7784_v59 = vld [vmem:[#allocation40_spill] sm:$0xff] }
 0x126   : > { %5150 = vmatmul.mubr.msk.f32.gmra.mrb[22].mxu1 %vm177_vm0, %v6624_v54  ;;  %5367 = vmatmul.mubr.msk.f32.vlgmr.msra.gmra.mrb[0].mxu0 %vm177_vm0, %v6323_v63  ;;  %v7785_v63 = vld [vmem:[#allocation12_spill] sm:$0xff] }
 0x127   : > { %5415 = vmatpush3.msk.msra.mxu0 %vm493_vm2, %v6720_v22  ;;  %5152 = vmatprep.mubr.msk.f32.mxu1 %vm177_vm0, %v6628_v50  ;;  %v7793_v22 = vld [vmem:[#allocation16_spill] sm:$0xff] }
 0x128   : > { %5369 = vmatprep.mubr.msk.f32.mxu0 %vm177_vm0, %v6330_v1  ;;  %v7786_v1 = vld [vmem:[#allocation31_spill] sm:$0xff] }
 0x12a   : > { %5153 = vmatmul.mubr.msk.f32.gmra.mrb[24].mxu1 %vm177_vm0, %v6640_v46  ;;  %5370 = vmatmul.mubr.msk.f32.gmra.mrb[2].mxu0 %vm177_vm0, %v6342_v3  ;;  %v7787_v3 = vld [vmem:[#allocation13_spill] sm:$0xff] }
 0x12b   : > { %5155 = vmatprep.mubr.msk.f32.mxu1 %vm177_vm0, %v6644_v42  ;;  %5372 = vmatprep.mubr.msk.f32.mxu0 %vm177_vm0, %v6344_v4  ;;  %v7788_v4 = vld [vmem:[#allocation32_spill] sm:$0xff] }
 0x12e   : > { %5156 = vmatmul.mubr.msk.f32.gmra.mrb[26].mxu1 %vm177_vm0, %v6656_v38  ;;  %5373 = vmatmul.mubr.msk.f32.gmra.mrb[4].mxu0 %vm177_vm0, %v6354_v5  ;;  %v7789_v5 = vld [vmem:[#allocation14_spill] sm:$0xff] }
 0x12f   : > { %5158 = vmatprep.mubr.msk.f32.mxu1 %vm177_vm0, %v6660_v33  ;;  %5375 = vmatprep.mubr.msk.f32.mxu0 %vm177_vm0, %v6357_v7  ;;  %v7790_v7 = vld [vmem:[#allocation33_spill] sm:$0xff] }
 0x132   : > { %5159 = vmatmul.mubr.msk.f32.gmra.mrb[28].mxu1 %vm177_vm0, %v6672_v30  ;;  %5376 = vmatmul.mubr.msk.f32.gmra.mrb[6].mxu0 %vm177_vm0, %v6371_v15  ;;  %v7791_v15 = vld [vmem:[#allocation15_spill] sm:$0xff] }
 0x133   : > { %5161 = vmatprep.mubr.msk.f32.mxu1 %vm177_vm0, %v6676_v28  ;;  %5378 = vmatprep.mubr.msk.f32.mxu0 %vm177_vm0, %v6375_v16  ;;  %v7792_v16 = vld [vmem:[#allocation34_spill] sm:$0xff] }
 0x136   : > { %5162 = vmatmul.mubr.msk.f32.gmra.mrb[30].mxu1 %vm177_vm0, %v7784_v59  ;;  %5379 = vmatmul.mubr.msk.f32.gmra.mrb[8].mxu0 %vm177_vm0, %v7785_v63  ;;  %v7797_v63 = vld [vmem:[#allocation18_spill] sm:$0xff] }
 0x137   : > { %5166 = vmatprep.mubr.msk.f32.mxu1 %vm177_vm0, %v7786_v1  ;;  %5381 = vmatprep.mubr.msk.f32.mxu0 %vm177_vm0, %v7787_v3  ;;  %v7798_v1 = vld [vmem:[#allocation37_spill] sm:$0xff]  ;;  %v7800_v3 = vld [vmem:[#allocation38_spill] sm:$0xff] }
 0x13a   : > { %5167 = vmatmul.mubr.msk.f32.vlgmr.msra.gmra.mrb[0].mxu1 %vm177_vm0, %v7788_v4  ;;  %5382 = vmatmul.mubr.msk.f32.gmra.mrb[10].mxu0 %vm177_vm0, %v7789_v5  ;;  %v7801_v4 = vld [vmem:[#allocation20_spill] sm:$0xff]  ;;  %v7802_v5 = vld [vmem:[#allocation21_spill] sm:$0xff] }
 0x13b   : > { %5169 = vmatprep.mubr.msk.f32.mxu1 %vm177_vm0, %v7790_v7  ;;  %5384 = vmatprep.mubr.msk.f32.mxu0 %vm177_vm0, %v7791_v15  ;;  %v7803_v7 = vld [vmem:[#allocation39_spill] sm:$0xff]  ;;  %v7804_v15 = vld [vmem:[#allocation22_spill] sm:$0xff] }
 0x13c   : > { %5499 = vmatpush3.msk.msra.mxu1 %vm493_vm2, %v6246_v2  ;;  %v7799_v2 = vld [vmem:[#allocation19_spill] sm:$0xff] }
 0x13e   : > { %5170 = vmatmul.mubr.msk.f32.gmra.mrb[2].mxu1 %vm177_vm0, %v7792_v16  ;;  %5385 = vmatmul.mubr.msk.f32.gmra.mrb[12].mxu0 %vm177_vm0, %v7793_v22  ;;  %v7805_v16 = vld [vmem:[#allocation23_spill] sm:$0xff]  ;;  %v7806_v22 = vld [vmem:[#allocation24_spill] sm:$0xff] }
 0x13f   : > { %5172 = vmatprep.mubr.msk.f32.mxu1 %vm177_vm0, %v7794_v52  ;;  %5387 = vmatprep.mubr.msk.f32.mxu0 %vm177_vm0, %v7795_v58  ;;  %v7808_v52 = vld [vmem:[#allocation26_spill] sm:$0xff]  ;;  %v3027_v58 = vld [vmem:[#allocation2 + $0x199] sm:$0xff] }
 0x142   : > { %5173 = vmatmul.mubr.msk.f32.gmra.mrb[4].mxu1 %vm177_vm0, %v7796_v14  ;;  %5388 = vmatmul.mubr.msk.f32.gmra.mrb[14].mxu0 %vm177_vm0, %v7797_v63 }
 0x143   : > { %5175 = vmatprep.mubr.msk.f32.mxu1 %vm177_vm0, %v7798_v1  ;;  %5390 = vmatprep.mubr.msk.f32.mxu0 %vm177_vm0, %v7799_v2 }
 0x146   : > { %5176 = vmatmul.mubr.msk.f32.gmra.mrb[6].mxu1 %vm177_vm0, %v7800_v3  ;;  %5391 = vmatmul.mubr.msk.f32.gmra.mrb[16].mxu0 %vm177_vm0, %v7801_v4 }
 0x147   : > { %5178 = vmatprep.mubr.msk.f32.mxu1 %vm177_vm0, %v6610_v26  ;;  %5393 = vmatprep.mubr.msk.f32.mxu0 %vm177_vm0, %v7802_v5  ;;  %v7807_v26 = vld [vmem:[#allocation25_spill] sm:$0xff] }
 0x14a   : > { %5179 = vmatmul.mubr.msk.f32.gmra.mrb[8].mxu1 %vm177_vm0, %v7803_v7  ;;  %5394 = vmatmul.mubr.msk.f32.gmra.mrb[18].mxu0 %vm177_vm0, %v7804_v15 }
 0x14b   : > { %5181 = vmatprep.mubr.msk.f32.mxu1 %vm177_vm0, %v6626_v0  ;;  %5396 = vmatprep.mubr.msk.f32.mxu0 %vm177_vm0, %v7805_v16  ;;  %v7809_v0 = vld [vmem:[#allocation27_spill] sm:$0xff] }
 0x14e   : > { %5182 = vmatmul.mubr.msk.f32.gmra.mrb[10].mxu1 %vm177_vm0, %v6638_v48  ;;  %5397 = vmatmul.mubr.msk.f32.gmra.mrb[20].mxu0 %vm177_vm0, %v7806_v22  ;;  %v7810_v48 = vld [vmem:[#allocation28_spill] sm:$0xff] }
 0x14f   : > { %5184 = vmatprep.mubr.msk.f32.mxu1 %vm177_vm0, %v6642_v44  ;;  %5399 = vmatprep.mubr.msk.f32.mxu0 %vm177_vm0, %v7807_v26  ;;  %v7811_v44 = vld [vmem:[#allocation29_spill] sm:$0xff] }
 0x152   : > { %5185 = vmatmul.mubr.msk.f32.gmra.mrb[12].mxu1 %vm177_vm0, %v6654_v40  ;;  %5400 = vmatmul.mubr.msk.f32.gmra.mrb[22].mxu0 %vm177_vm0, %v7808_v52  ;;  %v3025_v40 = vld [vmem:[#allocation2 + $0x181] sm:$0xff] }
 0x153   : > { %5187 = vmatprep.mubr.msk.f32.mxu1 %vm177_vm0, %v6658_v35  ;;  %5402 = vmatprep.mubr.msk.f32.mxu0 %vm177_vm0, %v7809_v0  ;;  %v7812_v35 = vld [vmem:[#allocation30_spill] sm:$0xff] }
 0x156   : > { %5188 = vmatmul.mubr.msk.f32.gmra.mrb[14].mxu1 %vm177_vm0, %v6670_v31  ;;  %5403 = vmatmul.mubr.msk.f32.gmra.mrb[24].mxu0 %vm177_vm0, %v7810_v48  ;;  %v3026_v31 = vld [vmem:[#allocation2 + $0x189] sm:$0xff] }
 0x157   : > { %5190 = vmatprep.mubr.msk.f32.mxu1 %vm177_vm0, %v6674_v29  ;;  %5405 = vmatprep.mubr.msk.f32.mxu0 %vm177_vm0, %v7811_v44  ;;  %v5962_v29 = vmov 0.0|0.0  }
 0x158   : > { %5486 = vmatprep.subr.bf16.mxu1 %v5962_v29 }
 0x15a   : > { %5191 = vmatmul.mubr.msk.f32.gmra.mrb[16].mxu1 %vm177_vm0, %v6686_v23  ;;  %5406 = vmatmul.mubr.msk.f32.gmra.mrb[26].mxu0 %vm177_vm0, %v7812_v35  ;;  %v3028_v23 = vld [vmem:[#allocation2 + $0x1a1] sm:$0xff] }
 0x15b   : > { %5193 = vmatprep.mubr.msk.f32.mxu1 %vm177_vm0, %v6690_v21  ;;  %5408 = vmatprep.mubr.msk.f32.mxu0 %vm177_vm0, %v3025_v40  ;;  %v3418_v21 = vld [vmem:[#allocation2 + $0x1a2] sm:$0xff] }
 0x15e   : > { %5194 = vmatmul.mubr.msk.f32.gmra.mrb[18].mxu1 %vm177_vm0, %v6702_v60  ;;  %5409 = vmatmul.mubr.msk.f32.gmra.mrb[28].mxu0 %vm177_vm0, %v3026_v31 }
 0x15f   : > { %5196 = vmatprep.mubr.msk.f32.mxu1 %vm177_vm0, %v6706_v56  ;;  %5411 = vmatprep.mubr.msk.f32.mxu0 %vm177_vm0, %v3027_v58 }
 0x162   : > { %5197 = vmatmul.mubr.msk.f32.gmra.mrb[20].mxu1 %vm177_vm0, %v6716_v17  ;;  %5412 = vmatmul.mubr.msk.f32.gmra.mrb[30].mxu0 %vm177_vm0, %v3028_v23  ;;  %v7813_v17 = vld [vmem:[#allocation41_spill] sm:$0xff] }
 0x163   : > { %5199 = vmatprep.mubr.msk.f32.mxu1 %vm177_vm0, %v6718_v20  ;;  %5416 = vmatprep.mubr.msk.f32.mxu0 %vm177_vm0, %v6462_v36  ;;  %v7814_v20 = vld [vmem:[#allocation42_spill] sm:$0xff] }
 0x166   : > { %5200 = vmatmul.mubr.msk.f32.gmra.mrb[22].mxu1 %vm177_vm0, %v6730_v18  ;;  %5417 = vmatmul.mubr.msk.f32.vlgmr.msra.gmra.mrb[0].mxu0 %vm177_vm0, %v6476_v39  ;;  %v3417_v18 = vld [vmem:[#allocation2 + $0x19a] sm:$0xff] }
 0x167   : > { %5202 = vmatprep.mubr.msk.f32.mxu1 %vm177_vm0, %v6734_v62  ;;  %5419 = vmatprep.mubr.msk.f32.mxu0 %vm177_vm0, %v6482_v41 }
 0x16a   : > { %5203 = vmatmul.mubr.msk.f32.gmra.mrb[24].mxu1 %vm177_vm0, %v6746_v37  ;;  %5420 = vmatmul.mubr.msk.f32.gmra.mrb[2].mxu0 %vm177_vm0, %v6496_v43 }
 0x16b   : > { %5205 = vmatprep.mubr.msk.f32.mxu1 %vm177_vm0, %v6748_v10  ;;  %5422 = vmatprep.mubr.msk.f32.mxu0 %vm177_vm0, %v6500_v45  ;;  %v5963_v45 = vmov 1.0|1.0  }
 0x16e   : > { %5206 = vmatmul.mubr.msk.f32.gmra.mrb[26].mxu1 %vm177_vm0, %v6758_v12  ;;  %5423 = vmatmul.mubr.msk.f32.gmra.mrb[4].mxu0 %vm177_vm0, %v6512_v47 }
 0x16f   : > { %5208 = vmatprep.mubr.msk.f32.mxu1 %vm177_vm0, %v6760_v8  ;;  %5425 = vmatprep.mubr.msk.f32.mxu0 %vm177_vm0, %v6516_v49 }
 0x172   : > { %5209 = vmatmul.mubr.msk.f32.gmra.mrb[28].mxu1 %vm177_vm0, %v6770_v24  ;;  %5426 = vmatmul.mubr.msk.f32.gmra.mrb[6].mxu0 %vm177_vm0, %v6528_v51 }
 0x173   : > { %5211 = vmatprep.mubr.msk.f32.mxu1 %vm177_vm0, %v6846_v32  ;;  %5428 = vmatprep.mubr.msk.f32.mxu0 %vm177_vm0, %v6530_v53 }
 0x176   : > { %5212 = vmatmul.mubr.msk.f32.gmra.mrb[30].mxu1 %vm177_vm0, %v6856_v34  ;;  %5429 = vmatmul.mubr.msk.f32.gmra.mrb[8].mxu0 %vm177_vm0, %v6539_v55  ;;  %v7823_v55 = vmov 0.0  }
 0x177   : > { %5246 = vmatprep.mubr.msk.f32.mxu1 %vm177_vm0, %v7802_v5  ;;  %5431 = vmatprep.mubr.msk.f32.mxu0 %vm177_vm0, %v6543_v57 }
 0x17a   : > { %5247 = vmatmul.mubr.msk.f32.vlgmr.msra.gmra.mrb[20].mxu1 %vm177_vm0, %v7804_v15  ;;  %5432 = vmatmul.mubr.msk.f32.gmra.mrb[10].mxu0 %vm177_vm0, %v6556_v61 }
 0x17b   : > { %5249 = vmatprep.mubr.msk.f32.mxu1 %vm177_vm0, %v7805_v16  ;;  %5434 = vmatprep.mubr.msk.f32.mxu0 %vm177_vm0, %v6560_v6 }
 0x17e   : > { %5250 = vmatmul.mubr.msk.f32.gmra.mrb[22].mxu1 %vm177_vm0, %v7806_v22  ;;  %5435 = vmatmul.mubr.msk.f32.gmra.mrb[12].mxu0 %vm177_vm0, %v6576_v9 }
 0x17f   : > { %5252 = vmatprep.mubr.msk.f32.mxu1 %vm177_vm0, %v7807_v26  ;;  %5437 = vmatprep.mubr.msk.f32.mxu0 %vm177_vm0, %v6580_v11 }
 0x182   : > { %5253 = vmatmul.mubr.msk.f32.gmra.mrb[24].mxu1 %vm177_vm0, %v7808_v52  ;;  %5438 = vmatmul.mubr.msk.f32.gmra.mrb[14].mxu0 %vm177_vm0, %v6592_v13 }
 0x183   : > { %5255 = vmatprep.mubr.msk.f32.mxu1 %vm177_vm0, %v7809_v0  ;;  %5440 = vmatprep.mubr.msk.f32.mxu0 %vm177_vm0, %v6596_v19 }
 0x186   : > { %5256 = vmatmul.mubr.msk.f32.gmra.mrb[26].mxu1 %vm177_vm0, %v7810_v48  ;;  %5441 = vmatmul.mubr.msk.f32.gmra.mrb[16].mxu0 %vm177_vm0, %v6608_v25 }
 0x187   : > { %5258 = vmatprep.mubr.msk.f32.mxu1 %vm177_vm0, %v7811_v44  ;;  %5443 = vmatprep.mubr.msk.f32.mxu0 %vm177_vm0, %v6612_v27 }
 0x18a   : > { %5259 = vmatmul.mubr.msk.f32.gmra.mrb[28].mxu1 %vm177_vm0, %v7812_v35  ;;  %5444 = vmatmul.mubr.msk.f32.gmra.mrb[18].mxu0 %vm177_vm0, %v6624_v54 }
 0x18b   : > { %5261 = vmatprep.mubr.msk.f32.mxu1 %vm177_vm0, %v3025_v40  ;;  %5446 = vmatprep.mubr.msk.f32.mxu0 %vm177_vm0, %v6628_v50 }
 0x18e   : > { %5262 = vmatmul.mubr.msk.f32.gmra.mrb[30].mxu1 %vm177_vm0, %v3026_v31  ;;  %5447 = vmatmul.mubr.msk.f32.gmra.mrb[20].mxu0 %vm177_vm0, %v6640_v46 }
 0x18f   : > { %5449 = vmatprep.mubr.msk.f32.mxu0 %vm177_vm0, %v6644_v42  ;;  %5472 = vmatprep.mubr.msk.f32.mxu1 %vm5964_vm9, %v7823_v55 }
 0x192   : > { %5450 = vmatmul.mubr.msk.f32.gmra.mrb[22].mxu0 %vm177_vm0, %v6656_v38 }
 0x193   : > { %5452 = vmatprep.mubr.msk.f32.mxu0 %vm177_vm0, %v6660_v33 }
 0x196   : > { %5453 = vmatmul.mubr.msk.f32.gmra.mrb[24].mxu0 %vm177_vm0, %v6672_v30  ;;  %v3777_v30 = vlaneseq }
 0x197   : > { %5455 = vmatprep.mubr.msk.f32.mxu0 %vm177_vm0, %v6676_v28 }
 0x198   : > { %v7101_v28 = vshrl.u32 %v3777_v30, 7  ;;  %v3783_v33 = vand.u32 127, %v3777_v30 }
 0x19a   : > { %5456 = vmatmul.mubr.msk.f32.gmra.mrb[26].mxu0 %vm177_vm0, %v7784_v59  ;;  %v3779_v36 = vadd.s32 8, %v7101_v28  ;;  %v3788_v38 = vand.u32 7, %v7101_v28  ;;  %v3836_v39 = vand.u32 7, %v3783_v33  ;;  %v3780_v46 = vadd.s32 16, %v7101_v28 }
 0x19b   : > { %5458 = vmatprep.mubr.msk.f32.mxu0 %vm177_vm0, %v7813_v17  ;;  %v3781_v47 = vadd.s32 24, %v7101_v28  ;;  %v4002_v43 = vsub.s32 0, %v7101_v28 }
 0x19c   : > { %v3795_v41 = vand.u32 7, %v3779_v36  ;;  %vm7105_vm3 = vcmp.eq.s32.totalorder %v3788_v38, %v3836_v39  ;;  %v3802_v49 = vand.u32 7, %v3780_v46 }
 0x19d   : > { %v3809_v50 = vand.u32 7, %v3781_v47 }
 0x19e   : > { %5459 = vmatmul.mubr.msk.f32.gmra.mrb[28].mxu0 %vm177_vm0, %v7814_v20  ;;  %vm7109_vm4 = vcmp.eq.s32.totalorder %v3795_v41, %v3836_v39  ;;  %vm7126_vm6 = vcmp.eq.s32.totalorder %v3802_v49, %v3836_v39 }
 0x19f   : > { %5461 = vmatprep.mubr.msk.f32.mxu0 %vm177_vm0, %v3417_v18  ;;  %vm5487_vm5 = vmpackc.low %vm7109_vm4, %vm7105_vm3  ;;  %vm7130_vm7 = vcmp.eq.s32.totalorder %v3809_v50, %v3836_v39 }
 0x1a0   : > { %5488 = vmatpush3.bf16.msk.msra.mxu1 %vm5487_vm5, %v5963_v45  ;;  %vm5490_vm8 = vmpackc.low %vm7130_vm7, %vm7126_vm6 }
 0x1a1   : > { %5489 = vmatprep.subr.bf16.mxu1 %v5962_v29 }
 0x1a2   : > { %5462 = vmatmul.mubr.msk.f32.gmra.mrb[30].mxu0 %vm177_vm0, %v3418_v21 }
 0x1a4   : > { %5491 = vmatpush3.bf16.msk.msra.mxu1 %vm5490_vm8, %v5963_v45 }
 0x1a5   : > { %5492 = vmatprep.subr.bf16.mxu1 %v5962_v29 }
 0x20d   : > { %v5168_v56 = vpop.f32.mrb[0].mxu1 }
 0x20e   : > { %v1635_v57 = vpop.f32.mrb[1].mxu1 }
 0x211   : > { %v5171_v60 = vpop.f32.mrb[2].mxu1 }
 0x212   : > { %v1645_v61 = vpop.f32.mrb[3].mxu1 }
 0x215   : > { %v5174_v62 = vpop.f32.mrb[4].mxu1 }
 0x216   : > { %v1655_v6 = vpop.f32.mrb[5].mxu1 }
 0x219   : > { %v5177_v8 = vpop.f32.mrb[6].mxu1 }
 0x21a   : > { %v1665_v9 = vpop.f32.mrb[7].mxu1 }
 0x21d   : > { %v5180_v10 = vpop.f32.mrb[8].mxu1 }
 0x21e   : > { %v1675_v11 = vpop.f32.mrb[9].mxu1 }
 0x221   : > { %v5183_v12 = vpop.f32.mrb[10].mxu1 }
 0x222   : > { %v1685_v13 = vpop.f32.mrb[11].mxu1 }
 0x225   : > { %v5186_v19 = vpop.f32.mrb[12].mxu1 }
 0x226   : > { %v1695_v24 = vpop.f32.mrb[13].mxu1 }
 0x229   : > { %v7147_v25 = vpop.f32.mrb[14].mxu1 }
 0x22a   : > { %v7149_v27 = vpop.f32.mrb[15].mxu1 }
 0x22d   : > { %v7151_v54 = vpop.f32.mrb[16].mxu1 }
 0x22e   : > { %v7153_v37 = vpop.f32.mrb[17].mxu1 }
 0x231   : > { %v7155_v32 = vpop.f32.mrb[18].mxu1 }
 0x232   : > { %v7157_v34 = vpop.f32.mrb[19].mxu1 }
 0x239   : > { %v5418_v59 = vpop.f32.mrb[0].mxu0 }
 0x23a   : > { %v7159_v14 = vadd.f32 %v5418_v59, %v5168_v56  ;;  %v3586_v63 = vpop.f32.mrb[1].mxu0 }
 0x23b   : > { %v7161_v1 = vadd.f32 %v3586_v63, %v1635_v57 }
 0x23c   : > { %v3858_v2 = vsel %vm3856_vm10, %v7159_v14, 0.0 }
 0x23d   : > { %v3857_v3 = vsel %vm3856_vm10, %v7161_v1, 0.0  ;;  %v5421_v4 = vpop.f32.mrb[2].mxu0 }
 0x23e   : > { %v7167_v5 = vadd.f32 %v5421_v4, %v5171_v60  ;;  %v3596_v7 = vpop.f32.mrb[3].mxu0  ;;  %v3859_v16 = vadd.f32 %v3858_v2, %v3857_v3 }
 0x23f   : > { %v7169_v15 = vadd.f32 %v3596_v7, %v1645_v61 }
 0x240   : > { %v3862_v44 = vsel %vm3856_vm10, %v7167_v5, 0.0 }
 0x241   : > { %v3860_v22 = vsel %vm3856_vm10, %v7169_v15, 0.0  ;;  %v5424_v26 = vpop.f32.mrb[4].mxu0 }
 0x242   : > { %v3861_v52 = vadd.f32 %v3860_v22, %v3859_v16  ;;  %v7173_v0 = vadd.f32 %v5424_v26, %v5174_v62  ;;  %v3606_v48 = vpop.f32.mrb[5].mxu0 }
 0x243   : > { %v7177_v40 = vadd.f32 %v3606_v48, %v1655_v6 }
 0x244   : > { %v3863_v35 = vadd.f32 %v3862_v44, %v3861_v52  ;;  %v3866_v20 = vsel %vm3856_vm10, %v7173_v0, 0.0 }
 0x245   : > { %v3864_v31 = vsel %vm3856_vm10, %v7177_v40, 0.0  ;;  %v5427_v58 = vpop.f32.mrb[6].mxu0 }
 0x246   : > { %v3865_v23 = vadd.f32 %v3864_v31, %v3863_v35  ;;  %v7181_v17 = vadd.f32 %v5427_v58, %v5177_v8  ;;  %v3616_v18 = vpop.f32.mrb[7].mxu0 }
 0x247   : > { %v7185_v21 = vadd.f32 %v3616_v18, %v1665_v9 }
 0x248   : > { %v3867_v30 = vadd.f32 %v3866_v20, %v3865_v23  ;;  %v3870_v46 = vsel %vm3856_vm10, %v7181_v17, 0.0 }
 0x249   : > { %v3868_v33 = vsel %vm3856_vm10, %v7185_v21, 0.0  ;;  %v5430_v36 = vpop.f32.mrb[8].mxu0 }
 0x24a   : > { %v3869_v38 = vadd.f32 %v3868_v33, %v3867_v30  ;;  %v7189_v39 = vadd.f32 %v5430_v36, %v5180_v10  ;;  %v3626_v41 = vpop.f32.mrb[9].mxu0 }
 0x24b   : > { %v7193_v47 = vadd.f32 %v3626_v41, %v1675_v11 }
 0x24c   : > { %v3871_v49 = vadd.f32 %v3870_v46, %v3869_v38  ;;  %v3874_v8 = vsel %vm3856_vm10, %v7189_v39, 0.0 }
 0x24d   : > { %v3872_v50 = vsel %vm3856_vm10, %v7193_v47, 0.0  ;;  %v5248_v56 = vpop.f32.mrb[20].mxu1  ;;  %v5433_v57 = vpop.f32.mrb[10].mxu0 }
 0x24e   : > { %v3873_v60 = vadd.f32 %v3872_v50, %v3871_v49  ;;  %v7197_v61 = vadd.f32 %v5433_v57, %v5183_v12  ;;  %v2125_v62 = vpop.f32.mrb[21].mxu1  ;;  %v3636_v6 = vpop.f32.mrb[11].mxu0 }
 0x24f   : > { %v7201_v9 = vadd.f32 %v3636_v6, %v1685_v13 }
 0x250   : > { %v3875_v10 = vadd.f32 %v3874_v8, %v3873_v60  ;;  %v3878_v12 = vsel %vm3856_vm10, %v7197_v61, 0.0 }
 0x251   : > { %v3876_v11 = vsel %vm3856_vm10, %v7201_v9, 0.0  ;;  %v5251_v59 = vpop.f32.mrb[22].mxu1  ;;  %v5436_v63 = vpop.f32.mrb[12].mxu0 }
 0x252   : > { %v3877_v2 = vadd.f32 %v3876_v11, %v3875_v10  ;;  %v7205_v3 = vadd.f32 %v5436_v63, %v5186_v19  ;;  %v2135_v4 = vpop.f32.mrb[23].mxu1  ;;  %v3646_v7 = vpop.f32.mrb[13].mxu0 }
 0x253   : > { %v7209_v16 = vadd.f32 %v3646_v7, %v1695_v24 }
 0x254   : > { %v3879_v22 = vadd.f32 %v3878_v12, %v3877_v2  ;;  %v3882_v31 = vsel %vm3856_vm10, %v7205_v3, 0.0 }
 0x255   : > { %v3880_v13 = vsel %vm3856_vm10, %v7209_v16, 0.0  ;;  %v5254_v26 = vpop.f32.mrb[24].mxu1  ;;  %v5439_v52 = vpop.f32.mrb[14].mxu0 }
 0x256   : > { %v3881_v48 = vadd.f32 %v3880_v13, %v3879_v22  ;;  %v7214_v44 = vadd.f32 %v5439_v52, %v7147_v25  ;;  %v2145_v35 = vpop.f32.mrb[25].mxu1  ;;  %v3656_v19 = vpop.f32.mrb[15].mxu0 }
 0x257   : > { %v7219_v58 = vadd.f32 %v3656_v19, %v7149_v27 }
 0x258   : > { %v3883_v24 = vadd.f32 %v3882_v31, %v3881_v48  ;;  %v3886_v38 = vsel %vm3856_vm10, %v7214_v44, 0.0 }
 0x259   : > { %v3884_v23 = vsel %vm3856_vm10, %v7219_v58, 0.0  ;;  %v5257_v18 = vpop.f32.mrb[26].mxu1  ;;  %v5442_v20 = vpop.f32.mrb[16].mxu0 }
 0x25a   : > { %v3885_v30 = vadd.f32 %v3884_v23, %v3883_v24  ;;  %v7224_v33 = vadd.f32 %v5442_v20, %v7151_v54  ;;  %v2155_v25 = vpop.f32.mrb[27].mxu1  ;;  %v3666_v36 = vpop.f32.mrb[17].mxu0 }
 0x25b   : > { %v7229_v41 = vadd.f32 %v3666_v36, %v7153_v37 }
 0x25c   : > { %v3887_v27 = vadd.f32 %v3886_v38, %v3885_v30  ;;  %v3890_v8 = vsel %vm3856_vm10, %v7224_v33, 0.0 }
 0x25d   : > { %v3888_v46 = vsel %vm3856_vm10, %v7229_v41, 0.0  ;;  %v5260_v49 = vpop.f32.mrb[28].mxu1  ;;  %v5445_v50 = vpop.f32.mrb[18].mxu0 }
 0x25e   : > { %v3889_v57 = vadd.f32 %v3888_v46, %v3887_v27  ;;  %v7234_v60 = vadd.f32 %v5445_v50, %v7155_v32  ;;  %v2165_v54 = vpop.f32.mrb[29].mxu1  ;;  %v3676_v6 = vpop.f32.mrb[19].mxu0 }
 0x25f   : > { %v7239_v10 = vadd.f32 %v3676_v6, %v7157_v34 }
 0x260   : > { %v3891_v37 = vadd.f32 %v3890_v8, %v3889_v57  ;;  %v3894_v13 = vsel %vm3856_vm10, %v7234_v60, 0.0 }
 0x261   : > { %v3892_v11 = vsel %vm3856_vm10, %v7239_v10, 0.0  ;;  %v5263_v63 = vpop.f32.mrb[30].mxu1  ;;  %v5448_v2 = vpop.f32.mrb[20].mxu0 }
 0x262   : > { %v3893_v7 = vadd.f32 %v3892_v11, %v3891_v37  ;;  %v7243_v12 = vadd.f32 %v5448_v2, %v5248_v56  ;;  %v2175_v22 = vpop.f32.mrb[31].mxu1  ;;  %v3686_v32 = vpop.f32.mrb[21].mxu0 }
 0x263   : > { %v7247_v52 = vadd.f32 %v3686_v32, %v2125_v62 }
 0x264   : > { %v3895_v48 = vadd.f32 %v3894_v13, %v3893_v7  ;;  %v3898_v56 = vsel %vm3856_vm10, %v7243_v12, 0.0 }
 0x265   : > { %v3896_v34 = vsel %vm3856_vm10, %v7247_v52, 0.0  ;;  %v5451_v19 = vpop.f32.mrb[22].mxu0 }
 0x266   : > { %v3897_v31 = vadd.f32 %v3896_v34, %v3895_v48  ;;  %v7251_v24 = vadd.f32 %v5451_v19, %v5251_v59  ;;  %v3696_v23 = vpop.f32.mrb[23].mxu0 }
 0x267   : > { %v7255_v20 = vadd.f32 %v3696_v23, %v2135_v4 }
 0x268   : > { %v3899_v30 = vadd.f32 %v3898_v56, %v3897_v31  ;;  %v3902_v50 = vsel %vm3856_vm10, %v7251_v24, 0.0 }
 0x269   : > { %v3900_v36 = vsel %vm3856_vm10, %v7255_v20, 0.0  ;;  %v5454_v62 = vpop.f32.mrb[24].mxu0 }
 0x26a   : > { %v3901_v38 = vadd.f32 %v3900_v36, %v3899_v30  ;;  %v7259_v27 = vadd.f32 %v5454_v62, %v5254_v26  ;;  %v3706_v46 = vpop.f32.mrb[25].mxu0 }
 0x26b   : > { %v7263_v59 = vadd.f32 %v3706_v46, %v2145_v35 }
 0x26c   : > { %v3903_v57 = vadd.f32 %v3902_v50, %v3901_v38  ;;  %v3906_v2 = vsel %vm3856_vm10, %v7259_v27, 0.0 }
 0x26d   : > { %v3904_v6 = vsel %vm3856_vm10, %v7263_v59, 0.0  ;;  %v5457_v4 = vpop.f32.mrb[26].mxu0 }
 0x26e   : > { %v3905_v8 = vadd.f32 %v3904_v6, %v3903_v57  ;;  %v7267_v37 = vadd.f32 %v5457_v4, %v5257_v18  ;;  %v3716_v11 = vpop.f32.mrb[27].mxu0 }
 0x26f   : > { %v7271_v26 = vadd.f32 %v3716_v11, %v2155_v25 }
 0x270   : > { %v3907_v7 = vadd.f32 %v3906_v2, %v3905_v8  ;;  %v3910_v19 = vsel %vm3856_vm10, %v7267_v37, 0.0 }
 0x271   : > { %v3908_v32 = vsel %vm3856_vm10, %v7271_v26, 0.0  ;;  %v5460_v35 = vpop.f32.mrb[28].mxu0 }
 0x272   : > { %v3909_v13 = vadd.f32 %v3908_v32, %v3907_v7  ;;  %v7275_v48 = vadd.f32 %v5460_v35, %v5260_v49  ;;  %v3726_v34 = vpop.f32.mrb[29].mxu0 }
 0x273   : > { %v7279_v18 = vadd.f32 %v3726_v34, %v2165_v54 }
 0x274   : > { %v3911_v31 = vadd.f32 %v3910_v19, %v3909_v13  ;;  %v3914_v62 = vsel %vm3856_vm10, %v7275_v48, 0.0 }
 0x275   : > { %v3912_v23 = vsel %vm3856_vm10, %v7279_v18, 0.0  ;;  %v5463_v25 = vpop.f32.mrb[30].mxu0 }
 0x276   : > { %v3913_v56 = vadd.f32 %v3912_v23, %v3911_v31  ;;  %v7283_v30 = vadd.f32 %v5463_v25, %v5263_v63  ;;  %v3736_v36 = vpop.f32.mrb[31].mxu0 }
 0x277   : > { %v7287_v49 = vadd.f32 %v3736_v36, %v2175_v22 }
 0x278   : > { %v3915_v38 = vadd.f32 %v3914_v62, %v3913_v56  ;;  %v3918_v50 = vsel %vm3856_vm10, %v7283_v30, 0.0 }
 0x279   : > { %v3916_v46 = vsel %vm3856_vm10, %v7287_v49, 0.0 }
 0x27a   : > { %v3917_v54 = vadd.f32 %v3916_v46, %v3915_v38 }
 0x27c   : > { %v3919_v57 = vadd.f32 %v3918_v50, %v3917_v54 }
 0x27e   : > { %v3920_v6 = vrot.slane %v3919_v57, 4 }
 0x280   : > { %v3921_v4 = vadd.f32 %v3920_v6, %v3919_v57 }
 0x282   : > { %v3922_v8 = vrot.slane %v3921_v4, 2 }
 0x284   : > { %v3923_v63 = vadd.f32 %v3922_v8, %v3921_v4 }
 0x286   : > { %v3924_v11 = vrot.slane %v3923_v63, 1 }
 0x288   : > { %v3925_v2 = vadd.f32 %v3924_v11, %v3923_v63 }
 0x28a   : > { %5473 = vmatmul.mubr.msk.f32.vlgmr.msra.gmra.mrb[32].mxu1 %vm3856_vm10, %v3925_v2 }
 0x28b   : > { %5494 = vmatpush3.bf16.msk.msra.mxu1 %vm5487_vm5, %v5963_v45  ;;  %5483 = vmatprep.mubr.msk.f32.mxu1 %vm5964_vm9, %v7823_v55 }
 0x28c   : > { %5495 = vmatprep.subr.bf16.mxu1 %v5962_v29 }
 0x28f   : > { %5497 = vmatpush3.bf16.msk.msra.mxu1 %vm5490_vm8, %v5963_v45 }
 0x35d   : > { %v3995_v22 = vpop.f32.mrb[32].mxu1 }
 0x35e   : > { %v5474_v7 = vpop.f32.mrb[33].mxu1  ;;  %v3999_v32 = vmul.f32 0.0009765625, %v3995_v22 }
 0x360   : > { %v7312_v42 = vrot.slane %v3999_v32, %v4002_v43 }
 0x362   : > { %v7316_v55 = vsub.f32 %v7161_v1, %v7312_v42  ;;  %v7320_v29 = vsub.f32 %v7159_v14, %v7312_v42  ;;  %v7324_v45 = vsub.f32 %v7169_v15, %v7312_v42  ;;  %v7328_v51 = vsub.f32 %v7167_v5, %v7312_v42 }
 0x363   : > { %v7336_v1 = vsub.f32 %v7177_v40, %v7312_v42  ;;  %v7342_v15 = vsub.f32 %v7173_v0, %v7312_v42  ;;  %v7350_v31 = vsub.f32 %v7185_v21, %v7312_v42  ;;  %v7357_v0 = vsub.f32 %v7181_v17, %v7312_v42 }
 0x364   : > { %v4036_v53 = vmul.f32 %v7316_v55, %v7316_v55  ;;  %v4037_v35 = vmul.f32 %v7320_v29, %v7320_v29  ;;  %v4038_v14 = vmul.f32 %v7324_v45, %v7324_v45  ;;  %v4039_v5 = vmul.f32 %v7328_v51, %v7328_v51 }
 0x365   : > { %v4040_v40 = vmul.f32 %v7336_v1, %v7336_v1  ;;  %v4041_v56 = vmul.f32 %v7342_v15, %v7342_v15  ;;  %v7364_v21 = vsub.f32 %v7193_v47, %v7312_v42  ;;  %v4042_v38 = vmul.f32 %v7350_v31, %v7350_v31 }
 0x366   : > { %v4068_v13 = vsel %vm3856_vm10, %v4036_v53, 0.0  ;;  %v4069_v34 = vsel %vm3856_vm10, %v4037_v35, 0.0  ;;  %v4071_v23 = vsel %vm3856_vm10, %v4038_v14, 0.0  ;;  %v4073_v36 = vsel %vm3856_vm10, %v4039_v5, 0.0 }
 0x367   : > { %v4070_v19 = vadd.f32 %v4069_v34, %v4068_v13  ;;  %v4075_v46 = vsel %vm3856_vm10, %v4040_v40, 0.0  ;;  %v7371_v17 = vsub.f32 %v7189_v39, %v7312_v42  ;;  %v4043_v50 = vmul.f32 %v7357_v0, %v7357_v0 }
 0x368   : > { %v4077_v57 = vsel %vm3856_vm10, %v4041_v56, 0.0  ;;  %v7378_v47 = vsub.f32 %v7201_v9, %v7312_v42  ;;  %v4044_v4 = vmul.f32 %v7364_v21, %v7364_v21  ;;  %v4079_v8 = vsel %vm3856_vm10, %v4042_v38, 0.0 }
 0x369   : > { %v4072_v25 = vadd.f32 %v4071_v23, %v4070_v19  ;;  %v7385_v39 = vsub.f32 %v7197_v61, %v7312_v42  ;;  %v4045_v11 = vmul.f32 %v7371_v17, %v7371_v17  ;;  %v4081_v2 = vsel %vm3856_vm10, %v4043_v50, 0.0 }
 0x36a   : > { %v7392_v9 = vsub.f32 %v7209_v16, %v7312_v42  ;;  %v4046_v7 = vmul.f32 %v7378_v47, %v7378_v47  ;;  %v4083_v32 = vsel %vm3856_vm10, %v4044_v4, 0.0  ;;  %v7399_v61 = vsub.f32 %v7205_v3, %v7312_v42 }
 0x36b   : > { %v4074_v62 = vadd.f32 %v4073_v36, %v4072_v25  ;;  %v4047_v35 = vmul.f32 %v7385_v39, %v7385_v39  ;;  %v4085_v14 = vsel %vm3856_vm10, %v4045_v11, 0.0  ;;  %v7406_v16 = vsub.f32 %v7219_v58, %v7312_v42 }
 0x36c   : > { %v4048_v13 = vmul.f32 %v7392_v9, %v7392_v9  ;;  %v4087_v34 = vsel %vm3856_vm10, %v4046_v7, 0.0  ;;  %v7413_v3 = vsub.f32 %v7214_v44, %v7312_v42  ;;  %v4049_v40 = vmul.f32 %v7399_v61, %v7399_v61 }
 0x36d   : > { %v4076_v54 = vadd.f32 %v4075_v46, %v4074_v62  ;;  %v4089_v23 = vsel %vm3856_vm10, %v4047_v35, 0.0  ;;  %v7420_v58 = vsub.f32 %v7229_v41, %v7312_v42  ;;  %v4050_v56 = vmul.f32 %v7406_v16, %v7406_v16 }
 0x36e   : > { %v4091_v36 = vsel %vm3856_vm10, %v4048_v13, 0.0  ;;  %v7427_v44 = vsub.f32 %v7224_v33, %v7312_v42  ;;  %v4051_v38 = vmul.f32 %v7413_v3, %v7413_v3  ;;  %v4093_v46 = vsel %vm3856_vm10, %v4049_v40, 0.0 }
 0x36f   : > { %v4078_v6 = vadd.f32 %v4077_v57, %v4076_v54  ;;  %v7434_v41 = vsub.f32 %v7239_v10, %v7312_v42  ;;  %v4052_v50 = vmul.f32 %v7420_v58, %v7420_v58  ;;  %v4095_v57 = vsel %vm3856_vm10, %v4050_v56, 0.0 }
 0x370   : > { %v7441_v33 = vsub.f32 %v7234_v60, %v7312_v42  ;;  %v4053_v4 = vmul.f32 %v7427_v44, %v7427_v44  ;;  %v7448_v10 = vsub.f32 %v7247_v52, %v7312_v42  ;;  %v7455_v60 = vsub.f32 %v7243_v12, %v7312_v42 }
 0x371   : > { %v4080_v63 = vadd.f32 %v4079_v8, %v4078_v6  ;;  %v4097_v8 = vsel %vm3856_vm10, %v4051_v38, 0.0  ;;  %v4054_v11 = vmul.f32 %v7434_v41, %v7434_v41  ;;  %v7462_v52 = vsub.f32 %v7255_v20, %v7312_v42 }
 0x372   : > { %v4055_v7 = vmul.f32 %v7441_v33, %v7441_v33  ;;  %v4056_v35 = vmul.f32 %v7448_v10, %v7448_v10  ;;  %v7469_v12 = vsub.f32 %v7251_v24, %v7312_v42  ;;  %v4057_v13 = vmul.f32 %v7455_v60, %v7455_v60 }
 0x373   : > { %v4082_v22 = vadd.f32 %v4081_v2, %v4080_v63  ;;  %v4099_v2 = vsel %vm3856_vm10, %v4052_v50, 0.0  ;;  %v7476_v20 = vsub.f32 %v7263_v59, %v7312_v42  ;;  %v4058_v40 = vmul.f32 %v7462_v52, %v7462_v52 }
 0x374   : > { %v7483_v24 = vsub.f32 %v7259_v27, %v7312_v42  ;;  %v4059_v56 = vmul.f32 %v7469_v12, %v7469_v12  ;;  %v7490_v59 = vsub.f32 %v7271_v26, %v7312_v42  ;;  %v7497_v27 = vsub.f32 %v7267_v37, %v7312_v42 }
 0x375   : > { %v4084_v53 = vadd.f32 %v4083_v32, %v4082_v22  ;;  %v4101_v32 = vsel %vm3856_vm10, %v4053_v4, 0.0  ;;  %v4060_v38 = vmul.f32 %v7476_v20, %v7476_v20  ;;  %v7504_v26 = vsub.f32 %v7279_v18, %v7312_v42 }
 0x376   : > { %v4061_v50 = vmul.f32 %v7483_v24, %v7483_v24  ;;  %v4062_v4 = vmul.f32 %v7490_v59, %v7490_v59  ;;  %v7511_v37 = vsub.f32 %v7275_v48, %v7312_v42  ;;  %v7518_v18 = vsub.f32 %v7287_v49, %v7312_v42 }
 0x377   : > { %v4086_v5 = vadd.f32 %v4085_v14, %v4084_v53  ;;  %v4103_v14 = vsel %vm3856_vm10, %v4054_v11, 0.0  ;;  %v4063_v11 = vmul.f32 %v7497_v27, %v7497_v27  ;;  %v7525_v48 = vsub.f32 %v7283_v30, %v7312_v42 }
 0x378   : > { %v4066_v49 = vmul.f32 %v7518_v18, %v7518_v18 }
 0x379   : > { %v4088_v19 = vadd.f32 %v4087_v34, %v4086_v5  ;;  %v4105_v34 = vsel %vm3856_vm10, %v4055_v7, 0.0  ;;  %v4064_v7 = vmul.f32 %v7504_v26, %v7504_v26 }
 0x37a   : > { %v4127_v30 = vsel %vm3856_vm10, %v4066_v49, 0.0 }
 0x37b   : > { %v4090_v25 = vadd.f32 %v4089_v23, %v4088_v19  ;;  %v4107_v23 = vsel %vm3856_vm10, %v4056_v35, 0.0  ;;  %v4065_v35 = vmul.f32 %v7511_v37, %v7511_v37 }
 0x37d   : > { %v4092_v62 = vadd.f32 %v4091_v36, %v4090_v25  ;;  %v4109_v36 = vsel %vm3856_vm10, %v4057_v13, 0.0  ;;  %v4123_v13 = vsel %vm3856_vm10, %v4064_v7, 0.0 }
 0x37f   : > { %v4094_v54 = vadd.f32 %v4093_v46, %v4092_v62  ;;  %v4111_v46 = vsel %vm3856_vm10, %v4058_v40, 0.0  ;;  %v4125_v40 = vsel %vm3856_vm10, %v4065_v35, 0.0 }
 0x381   : > { %v4096_v6 = vadd.f32 %v4095_v57, %v4094_v54  ;;  %v4113_v57 = vsel %vm3856_vm10, %v4059_v56, 0.0 }
 0x383   : > { %v4098_v63 = vadd.f32 %v4097_v8, %v4096_v6  ;;  %v4115_v8 = vsel %vm3856_vm10, %v4060_v38, 0.0 }
 0x385   : > { %v4100_v22 = vadd.f32 %v4099_v2, %v4098_v63  ;;  %v4117_v2 = vsel %vm3856_vm10, %v4061_v50, 0.0 }
 0x387   : > { %v4102_v53 = vadd.f32 %v4101_v32, %v4100_v22  ;;  %v4119_v32 = vsel %vm3856_vm10, %v4062_v4, 0.0 }
 0x389   : > { %v4104_v5 = vadd.f32 %v4103_v14, %v4102_v53  ;;  %v4121_v14 = vsel %vm3856_vm10, %v4063_v11, 0.0 }
 0x38b   : > { %v4106_v19 = vadd.f32 %v4105_v34, %v4104_v5 }
 0x38d   : > { %v4108_v25 = vadd.f32 %v4107_v23, %v4106_v19  ;;  %v4067_v19 = vmul.f32 %v7525_v48, %v7525_v48 }
 0x38f   : > { %v4110_v62 = vadd.f32 %v4109_v36, %v4108_v25  ;;  %v4129_v25 = vsel %vm3856_vm10, %v4067_v19, 0.0 }
 0x391   : > { %v4112_v54 = vadd.f32 %v4111_v46, %v4110_v62 }
 0x393   : > { %v4114_v6 = vadd.f32 %v4113_v57, %v4112_v54 }
 0x395   : > { %v4116_v63 = vadd.f32 %v4115_v8, %v4114_v6 }
 0x397   : > { %v4118_v22 = vadd.f32 %v4117_v2, %v4116_v63 }
 0x399   : > { %v4120_v53 = vadd.f32 %v4119_v32, %v4118_v22 }
 0x39b   : > { %v4122_v5 = vadd.f32 %v4121_v14, %v4120_v53 }
 0x39d   : > { %v4124_v34 = vadd.f32 %v4123_v13, %v4122_v5 }
 0x39f   : > { %v4126_v23 = vadd.f32 %v4125_v40, %v4124_v34 }
 0x3a1   : > { %v4128_v42 = vadd.f32 %v4127_v30, %v4126_v23 }
 0x3a3   : > { %v4130_v56 = vadd.f32 %v4129_v25, %v4128_v42 }
 0x3a5   : > { %v4131_v36 = vrot.slane %v4130_v56, 4 }
 0x3a7   : > { %v4132_v62 = vadd.f32 %v4131_v36, %v4130_v56 }
 0x3a9   : > { %v4133_v38 = vrot.slane %v4132_v62, 2 }
 0x3ab   : > { %v4134_v46 = vadd.f32 %v4133_v38, %v4132_v62 }
 0x3ad   : > { %v4135_v54 = vrot.slane %v4134_v46, 1 }
 0x3af   : > { %v4136_v50 = vadd.f32 %v4135_v54, %v4134_v46 }
 0x3b1   : > { %5484 = vmatmul.mubr.msk.f32.vlgmr.msra.gmra.mrb[34].mxu1 %vm3856_vm10, %v4136_v50 }
 0x484   : > { %v4206_v57 = vpop.f32.mrb[34].mxu1 }
 0x485   : > { %v4210_v6 = vmul.f32 0.0009765625, %v4206_v57  ;;  %v5485_v4 = vpop.f32.mrb[35].mxu1 }
 0x487   : > { %v4211_v8 = vadd.f32 1e-05, %v4210_v6 }
 0x489   : > { %5823 = vrsqrt.f32 %v4211_v8 }
 0x493   : > { %v5824_v63 = vpop.eup %5823 }
 0x494   : > { %v4216_v11 = vrot.slane %v5824_v63, %v4002_v43 }
 0x496   : > { %v4217_v2 = vmul.f32 %v4216_v11, %v7316_v55  ;;  %v4218_v22 = vmul.f32 %v4216_v11, %v7320_v29  ;;  %v4219_v7 = vmul.f32 %v4216_v11, %v7324_v45  ;;  %v4220_v32 = vmul.f32 %v4216_v11, %v7328_v51 }
 0x497   : > { %v4221_v53 = vmul.f32 %v4216_v11, %v7336_v1  ;;  %v4222_v35 = vmul.f32 %v4216_v11, %v7342_v15  ;;  %v4223_v14 = vmul.f32 %v4216_v11, %v7350_v31  ;;  %v4224_v5 = vmul.f32 %v4216_v11, %v7357_v0 }
 0x498   : > { %v4225_v49 = vmul.f32 %v4216_v11, %v7364_v21  ;;  %v4226_v28 = vmul.f32 %v4216_v11, %v7371_v17  ;;  %v4227_v43 = vmul.f32 %v4216_v11, %v7378_v47  ;;  %v4228_v55 = vmul.f32 %v4216_v11, %v7385_v39  ;;  %4249 = vst.msk [vmem:[%s7555_s15] sm:$0xff] %vm3856_vm10, %v4217_v2 }
 0x499   : > { %4250 = vst.msk [vmem:[%s7555_s15 + $0x8] sm:$0xff] %vm3856_vm10, %v4218_v22  ;;  %4251 = vst.msk [vmem:[%s7555_s15 + $0x10] sm:$0xff] %vm3856_vm10, %v4219_v7  ;;  %v4229_v29 = vmul.f32 %v4216_v11, %v7392_v9  ;;  %v4230_v45 = vmul.f32 %v4216_v11, %v7399_v61  ;;  %v4231_v51 = vmul.f32 %v4216_v11, %v7406_v16 }
 0x49a   : > { %4252 = vst.msk [vmem:[%s7555_s15 + $0x18] sm:$0xff] %vm3856_vm10, %v4220_v32  ;;  %v4232_v1 = vmul.f32 %v4216_v11, %v7413_v3  ;;  %4253 = vst.msk [vmem:[%s7555_s15 + $0x20] sm:$0xff] %vm3856_vm10, %v4221_v53  ;;  %v4233_v15 = vmul.f32 %v4216_v11, %v7420_v58  ;;  %v4234_v31 = vmul.f32 %v4216_v11, %v7427_v44 }
 0x49b   : > { %4254 = vst.msk [vmem:[%s7555_s15 + $0x28] sm:$0xff] %vm3856_vm10, %v4222_v35  ;;  %4255 = vst.msk [vmem:[%s7555_s15 + $0x30] sm:$0xff] %vm3856_vm10, %v4223_v14  ;;  %v4235_v0 = vmul.f32 %v4216_v11, %v7434_v41  ;;  %v4236_v21 = vmul.f32 %v4216_v11, %v7441_v33  ;;  %v4237_v17 = vmul.f32 %v4216_v11, %v7448_v10 }
 0x49c   : > { %4256 = vst.msk [vmem:[%s7555_s15 + $0x38] sm:$0xff] %vm3856_vm10, %v4224_v5  ;;  %4257 = vst.msk [vmem:[%s7555_s15 + $0x40] sm:$0xff] %vm3856_vm10, %v4225_v49  ;;  %v4238_v47 = vmul.f32 %v4216_v11, %v7455_v60  ;;  %v4239_v39 = vmul.f32 %v4216_v11, %v7462_v52  ;;  %v4240_v9 = vmul.f32 %v4216_v11, %v7469_v12 }
 0x49d   : > { %4258 = vst.msk [vmem:[%s7555_s15 + $0x48] sm:$0xff] %vm3856_vm10, %v4226_v28  ;;  %4259 = vst.msk [vmem:[%s7555_s15 + $0x50] sm:$0xff] %vm3856_vm10, %v4227_v43  ;;  %v4241_v61 = vmul.f32 %v4216_v11, %v7476_v20  ;;  %v4242_v16 = vmul.f32 %v4216_v11, %v7483_v24  ;;  %v4243_v3 = vmul.f32 %v4216_v11, %v7490_v59 }
 0x49e   : > { %4260 = vst.msk [vmem:[%s7555_s15 + $0x58] sm:$0xff] %vm3856_vm10, %v4228_v55  ;;  %4261 = vst.msk [vmem:[%s7555_s15 + $0x60] sm:$0xff] %vm3856_vm10, %v4229_v29  ;;  %v4244_v58 = vmul.f32 %v4216_v11, %v7497_v27  ;;  %v4245_v44 = vmul.f32 %v4216_v11, %v7504_v26  ;;  %v4246_v41 = vmul.f32 %v4216_v11, %v7511_v37 }
 0x49f   : > { %4262 = vst.msk [vmem:[%s7555_s15 + $0x68] sm:$0xff] %vm3856_vm10, %v4230_v45  ;;  %4263 = vst.msk [vmem:[%s7555_s15 + $0x70] sm:$0xff] %vm3856_vm10, %v4231_v51  ;;  %v4247_v33 = vmul.f32 %v4216_v11, %v7518_v18  ;;  %v4248_v10 = vmul.f32 %v4216_v11, %v7525_v48 }
 0x4a0   : > { %4264 = vst.msk [vmem:[%s7555_s15 + $0x78] sm:$0xff] %vm3856_vm10, %v4232_v1  ;;  %4265 = vst.msk [vmem:[%s7555_s15 + $0x80] sm:$0xff] %vm3856_vm10, %v4233_v15 }
 0x4a1   : > { %4266 = vst.msk [vmem:[%s7555_s15 + $0x88] sm:$0xff] %vm3856_vm10, %v4234_v31  ;;  %4267 = vst.msk [vmem:[%s7555_s15 + $0x90] sm:$0xff] %vm3856_vm10, %v4235_v0 }
 0x4a2   : > { %4268 = vst.msk [vmem:[%s7555_s15 + $0x98] sm:$0xff] %vm3856_vm10, %v4236_v21  ;;  %4269 = vst.msk [vmem:[%s7555_s15 + $0xa0] sm:$0xff] %vm3856_vm10, %v4237_v17 }
 0x4a3   : > { %4270 = vst.msk [vmem:[%s7555_s15 + $0xa8] sm:$0xff] %vm3856_vm10, %v4238_v47  ;;  %4271 = vst.msk [vmem:[%s7555_s15 + $0xb0] sm:$0xff] %vm3856_vm10, %v4239_v39 }
 0x4a4   : > { %4272 = vst.msk [vmem:[%s7555_s15 + $0xb8] sm:$0xff] %vm3856_vm10, %v4240_v9  ;;  %4273 = vst.msk [vmem:[%s7555_s15 + $0xc0] sm:$0xff] %vm3856_vm10, %v4241_v61 }
 0x4a5   : > { %4274 = vst.msk [vmem:[%s7555_s15 + $0xc8] sm:$0xff] %vm3856_vm10, %v4242_v16  ;;  %4275 = vst.msk [vmem:[%s7555_s15 + $0xd0] sm:$0xff] %vm3856_vm10, %v4243_v3 }
 0x4a6   : > { %4276 = vst.msk [vmem:[%s7555_s15 + $0xd8] sm:$0xff] %vm3856_vm10, %v4244_v58  ;;  %4277 = vst.msk [vmem:[%s7555_s15 + $0xe0] sm:$0xff] %vm3856_vm10, %v4245_v44 }
 0x4a7   : > { %4278 = vst.msk [vmem:[%s7555_s15 + $0xe8] sm:$0xff] %vm3856_vm10, %v4246_v41  ;;  %4279 = vst.msk [vmem:[%s7555_s15 + $0xf0] sm:$0xff] %vm3856_vm10, %v4247_v33 }
 0x4a8   : > { %4280 = vst.msk [vmem:[%s7555_s15 + $0xf8] sm:$0xff] %vm3856_vm10, %v4248_v10 }
 0x4a9   : > { %5896 = shalt.err (!%p5893_p7)
}
 0x4aa   : > { %s5897_s18 = scalar_lea.hbm %s7618_s23, 4096  ;;  %s5901_s20 = scalar_lea.hbm %s7694_s2, 8192 }
 0x4ab   : > { %p5898_p9 = scmp.ne.s32.totalorder %s7618_s23, %s5897_s18  ;;  %p5902_p5 = scmp.lt.u32.totalorder %s7618_s23, %s7694_s2 }
 0x4ac   : > { %p5903_p11 = scmp.lt.u32.totalorder %s5901_s20, %s5897_s18  ;;  %p5905_p4 = scmp.lt.u32.totalorder %s5897_s18, %s7618_s23 }
 0x4ad   : > { %p5899_p2 = pnand %p5898_p9, %p6074_p12 }
 0x4ae   : > { %p5904_p1 = por %p5903_p11, %p5902_p5 }
 0x4af   : > { %p5900_p0 = pneg %p5899_p2 }
 0x4b0   : > { %p5906_p6 = por %p5905_p4, %p5904_p1 }
 0x4b2   : > { %p5907_p8 = pnand %p5906_p6, %p5900_p0 }
 0x4b4   : > { %5910 = shalt.err (!%p5907_p8)
}
 0x4b5   : > { %s5966_s30 = smov 128   ;;  %s5967_s3 = smov 8  }
 0x4b6   : > { %5762 = dma.vmem_to_hbm [thread:$0]  (%p6074_p12), %s7620_s27, 4096, %s7618_s23, %s4282_s28, %s5966_s30, %s5966_s30, %s5967_s3  }
 0x4b7 PF: > { %s4310_s15 = sand.u32 1, %s5941_s9   ;;  %p7824_p10 = scmp.ne.s32.totalorder %s7743_s16, 0 }
 0x4b8   : > { %p7825_p13 = scmp.ge.s32.totalorder %s5953_s12, 2  ;;  %s4311_s17 = scalar_lea.sflag [#allocation5], %s4310_s15 }
 0x4ba   : > { %p5773_p3 = pnand %p7825_p13, %p7824_p10 }
 0x4bc   : > { %5936 = dma.done.wait (!%p5773_p3), %s4311_s17, 4096  }
 0x4bd   : > { %5938 = vsyncadd (!%p5773_p3), %s4311_s17, 4294963200  ;;  %p16_p7 = scmp.ge.s32.totalorder %s6039_s21, 4   ;;  %s7826_s9 = smov %s5945_s10 }
 0x4be   : > { %s7827_s10 = smov %s5949_s11  ;;  %s7828_s11 = smov %s6070_s8 }
 0x4bf   : > { %s7829_s12 = smov %s6039_s21  ;;  %18 = sbr.rel (!%p16_p7) target bundleno = 6 (0x6), region = 87 }
 0x4c6   :  { %4316 = vsyncpa [#allocation4], 1 }
 0x4c7   :  { %4318 = vsyncpa [#allocation4 + $0x1], 1 }
 0x4c8   :  { %4319 = vsyncpa [#allocation7], 1 }
 0x4c9   :  { %4320 = vsyncpa [#allocation5], 1 }
 0x4ca   :  { %4322 = vsyncpa [#allocation5 + $0x1], 1 }

</bundles_post_ra>
